<compile_context>
chip_gen: v6e
topology: v6e:2x2x1
jax: 0.10.0
libtpu: 0.0.40
codegen_flags: <defaults>
</compile_context>

<pallas_src>
import jax
import jax.numpy as jnp
from jax import lax
from jax.experimental import pallas as pl
from jax.experimental.pallas import tpu as pltpu


def _make_forecaster_kernel(T, B, C, H, W):
    CB = C * B          # channel*batch packed into lane blocks
    L = W * CB          # lane extent (128 at the test shapes -> lane-dense)

    def kernel(dt_ref,                    # SMEM (T,)
               y0_ref, stim_ref,          # VMEM (H, L)
               d_ref, k_ref, b_ref,       # VMEM (H, L)  pre-broadcast coefficients
               mix_ref,                   # VMEM (L, L)  1x1-conv lane-mixing operator
               out_ref):                  # VMEM (T, H, L)
        # Loop-invariant operands: loaded once, live across the whole time loop.
        stim = stim_ref[...]
        d_coef = d_ref[...]
        k_coef = k_ref[...]
        bias = b_ref[...]
        mix = mix_ref[...]

        def step(s, y):
            # forecasts[s] == state *before* this step (odeint convention);
            # full (16, 128) unmasked store, channel-0 extraction happens in the
            # wrapper (free in XLA).
            out_ref[s] = y

            # Periodic 2-D Laplacian via XLU rolls (sign-agnostic +/- pairs):
            #   H neighbours: sublane rolls by +/-1
            #   W neighbours: lane rolls by +/-C*B (W is the outer lane factor)
            lap = (pltpu.roll(y, 1, axis=0) + pltpu.roll(y, H - 1, axis=0)
                   + pltpu.roll(y, CB, axis=1) + pltpu.roll(y, L - CB, axis=1)
                   - 4.0 * y)

            # Physics: diffusion + logistic reaction + coordinate stimulation.
            phys = d_coef * lap + k_coef * (y * (1.0 - y)) + stim

            # Data-driven residual: 1x1 channel mixing as one lane-dense MXU
            # matmul (block-diagonal operator built host-side) + tanh (EUP).
            aug = jnp.tanh(
                jnp.dot(y, mix, preferred_element_type=jnp.float32) + bias)

            # Explicit Euler update; state stays in vregs as the loop carry.
            return y + dt_ref[s] * (phys + aug)

        y_last = lax.fori_loop(0, T - 1, step, y0_ref[...], unroll=True)
        # Final forecast; the old dt == 0 derivative computation is skipped.
        out_ref[T - 1] = y_last

    return kernel


def forecaster_forward(yT, coord_stim, t, params):
    """Mirrors Forecaster.forward(yT, coord_stim, t) -> (forecasts[:, :, [0]], parameters)."""
    B, C, H, W = yT.shape
    T = int(t.shape[0])
    CB = C * B
    L = W * CB

    # Per-step dt on the provided time grid.
    dt = jnp.concatenate([jnp.diff(t), jnp.zeros((1,), t.dtype)]).astype(jnp.float32)

    # ---- lane-dense repacking (free XLA reshapes/transposes, outside kernel) --
    # (B, C, H, W) -> (H, W*C*B); lane index = w*C*B + c*B + b.
    def pack(x):
        return jnp.transpose(x, (2, 3, 1, 0)).reshape(H, L).astype(jnp.float32)

    y0_packed = pack(yT)
    stim_packed = pack(jnp.broadcast_to(coord_stim, (B, C, H, W)))

    d, k = params["phy_param"][0], params["phy_param"][1]        # (C,), (C,)
    w_mix, b_mix = params["w_mix"], params["b_mix"]              # (C, C), (C,)

    # Per-channel coefficients as full (H, L) tiles: hoists every per-step
    # scalar->vreg broadcast out of the kernel loop.
    def lane_tile(v):                                            # (C,) -> (H, L)
        row = jnp.tile(jnp.repeat(v, B), W)
        return jnp.broadcast_to(row[None, :], (H, L)).astype(jnp.float32)

    d_full, k_full, b_full = lane_tile(d), lane_tile(k), lane_tile(b_mix)

    # 1x1-conv channel mixing as a lane-mixing matmul:
    #   out[h, w*CB + c*B + b] = sum_cc w_mix[c, cc] * y[h, w*CB + cc*B + b]
    #   => y @ M  with  M = kron(I_W, kron(w_mix^T, I_B))   (L x L = 128 x 128)
    mix_op = jnp.kron(jnp.eye(W, dtype=jnp.float32),
                      jnp.kron(w_mix.T.astype(jnp.float32),
                               jnp.eye(B, dtype=jnp.float32)))

    kernel = _make_forecaster_kernel(T, B, C, H, W)
    forecasts_packed = pl.pallas_call(
        kernel,
        out_shape=jax.ShapeDtypeStruct((T, H, L), jnp.float32),
        in_specs=[
            pl.BlockSpec(memory_space=pltpu.MemorySpace.SMEM),   # dt       (T,)
            pl.BlockSpec(memory_space=pltpu.MemorySpace.VMEM),   # y0       (H, L)
            pl.BlockSpec(memory_space=pltpu.MemorySpace.VMEM),   # stim     (H, L)
            pl.BlockSpec(memory_space=pltpu.MemorySpace.VMEM),   # d_full   (H, L)
            pl.BlockSpec(memory_space=pltpu.MemorySpace.VMEM),   # k_full   (H, L)
            pl.BlockSpec(memory_space=pltpu.MemorySpace.VMEM),   # b_full   (H, L)
            pl.BlockSpec(memory_space=pltpu.MemorySpace.VMEM),   # mix_op   (L, L)
        ],
        out_specs=pl.BlockSpec(memory_space=pltpu.MemorySpace.VMEM),
    )(dt, y0_packed, stim_packed, d_full, k_full, b_full, mix_op)

    # Unpack: (T, H, L) -> (T, H, W, C, B); keep channel 0 -> (T, B, 1, H, W).
    f = forecasts_packed.reshape(T, H, W, C, B)
    forecasts_ch0 = jnp.transpose(f[:, :, :, 0, :], (0, 3, 1, 2))[:, :, None, :, :]
    parameters = params["phy_param"]                             # == phy_mod.param
    return forecasts_ch0, parameters


if __name__ == "__main__":
    B, C, H, W, T = 2, 4, 16, 16, 8

    key = jax.random.PRNGKey(0)
    k_d, k_k, k_w, k_b, k_y, k_s = jax.random.split(key, 6)

    # deterministic synthetic parameters (physics params + 1x1-conv residual)
    params = {
        "phy_param": jnp.stack([
            0.05 + 0.05 * jax.random.uniform(k_d, (C,)),   # diffusion d_c
            0.50 + 0.50 * jax.random.uniform(k_k, (C,)),   # reaction  k_c
        ]).astype(jnp.float32),
        "w_mix": (0.1 * jax.random.normal(k_w, (C, C))).astype(jnp.float32),
        "b_mix": (0.1 * jax.random.normal(k_b, (C,))).astype(jnp.float32),
    }

    # deterministic example inputs
    yT = jax.random.uniform(k_y, (B, C, H, W), dtype=jnp.float32)
    coord_stim = 0.1 * jax.random.normal(k_s, (B, 1, H, W), dtype=jnp.float32)
    t = jnp.linspace(0.0, 0.7, T).astype(jnp.float32)

    forecasts, parameters = forecaster_forward(yT, coord_stim, t, params)
    forecasts = jax.block_until_ready(forecasts)
    parameters = jax.block_until_ready(parameters)

    assert forecasts.shape == (T, B, 1, H, W), forecasts.shape
    assert parameters.shape == (2, C), parameters.shape
    assert bool(jnp.all(jnp.isfinite(forecasts)))
    # forecasts[0] must be exactly the (packed -> stored -> unpacked) channel-0
    # slice of y0 (pure data movement, validates the lane-dense layout plumbing).
    assert bool(jnp.allclose(forecasts[0, :, 0], yT[:, 0], atol=1e-6))
    print("KERNEL_OK")
</pallas_src>

<mosaic_0001>
module attributes {stable_mosaic.version = 11 : i64} {
  func.func @kernel(%arg0: memref<8xf32, #tpu.memory_space<smem>>, %arg1: memref<16x128xf32, #tpu.memory_space<vmem>>, %arg2: memref<16x128xf32, #tpu.memory_space<vmem>>, %arg3: memref<16x128xf32, #tpu.memory_space<vmem>>, %arg4: memref<16x128xf32, #tpu.memory_space<vmem>>, %arg5: memref<16x128xf32, #tpu.memory_space<vmem>>, %arg6: memref<128x128xf32, #tpu.memory_space<vmem>>, %arg7: memref<8x16x128xf32, #tpu.memory_space<vmem>>) attributes {dimension_semantics = [], scalar_prefetch = 0 : i64, scratch_operands = 0 : i64, tpu.core_type = #tpu.core_type<tc>} {
    %c0 = arith.constant 0 : index
    %c0_0 = arith.constant 0 : index
    %0 = vector.load %arg2[%c0, %c0_0] : memref<16x128xf32, #tpu.memory_space<vmem>>, vector<16x128xf32>
    %c0_1 = arith.constant 0 : index
    %c0_2 = arith.constant 0 : index
    %1 = vector.load %arg3[%c0_1, %c0_2] : memref<16x128xf32, #tpu.memory_space<vmem>>, vector<16x128xf32>
    %c0_3 = arith.constant 0 : index
    %c0_4 = arith.constant 0 : index
    %2 = vector.load %arg4[%c0_3, %c0_4] : memref<16x128xf32, #tpu.memory_space<vmem>>, vector<16x128xf32>
    %c0_5 = arith.constant 0 : index
    %c0_6 = arith.constant 0 : index
    %3 = vector.load %arg5[%c0_5, %c0_6] : memref<16x128xf32, #tpu.memory_space<vmem>>, vector<16x128xf32>
    %c0_7 = arith.constant 0 : index
    %c0_8 = arith.constant 0 : index
    %4 = vector.load %arg6[%c0_7, %c0_8] : memref<128x128xf32, #tpu.memory_space<vmem>>, vector<128x128xf32>
    %c0_9 = arith.constant 0 : index
    %c0_10 = arith.constant 0 : index
    %5 = vector.load %arg1[%c0_9, %c0_10] : memref<16x128xf32, #tpu.memory_space<vmem>>, vector<16x128xf32>
    %c0_i32 = arith.constant 0 : i32
    %6 = arith.index_cast %c0_i32 : i32 to index
    %c0_11 = arith.constant 0 : index
    %c0_12 = arith.constant 0 : index
    %7 = vector.load %arg7[%6, %c0_11, %c0_12] : memref<8x16x128xf32, #tpu.memory_space<vmem>>, vector<1x16x128xf32>
    %8 = vector.shape_cast %7 : vector<1x16x128xf32> to vector<16x128xf32>
    %9 = vector.shape_cast %5 : vector<16x128xf32> to vector<1x16x128xf32>
    tpu.vector_store %arg7[%6, %c0_11, %c0_12], %9 {strides = array<i32>} : memref<8x16x128xf32, #tpu.memory_space<vmem>>, vector<1x16x128xf32>,
    %c1_i32 = arith.constant 1 : i32
    %10 = tpu.dynamic_rotate %5 by %c1_i32 dim 0 : vector<16x128xf32>, i32 -> vector<16x128xf32>
    %c15_i32 = arith.constant 15 : i32
    %11 = tpu.dynamic_rotate %5 by %c15_i32 dim 0 : vector<16x128xf32>, i32 -> vector<16x128xf32>
    %12 = arith.addf %10, %11 : vector<16x128xf32>
    %c8_i32 = arith.constant 8 : i32
    %13 = tpu.dynamic_rotate %5 by %c8_i32 dim 1 : vector<16x128xf32>, i32 -> vector<16x128xf32>
    %14 = arith.addf %12, %13 : vector<16x128xf32>
    %c120_i32 = arith.constant 120 : i32
    %15 = tpu.dynamic_rotate %5 by %c120_i32 dim 1 : vector<16x128xf32>, i32 -> vector<16x128xf32>
    %16 = arith.addf %14, %15 : vector<16x128xf32>
    %cst = arith.constant 4.000000e+00 : f32
    %17 = vector.broadcast %cst : f32 to vector<16x128xf32>
    %18 = arith.mulf %17, %5 : vector<16x128xf32>
    %19 = arith.subf %16, %18 : vector<16x128xf32>
    %20 = arith.mulf %1, %19 : vector<16x128xf32>
    %cst_13 = arith.constant 1.000000e+00 : f32
    %21 = vector.broadcast %cst_13 : f32 to vector<16x128xf32>
    %22 = arith.subf %21, %5 : vector<16x128xf32>
    %23 = arith.mulf %5, %22 : vector<16x128xf32>
    %24 = arith.mulf %2, %23 : vector<16x128xf32>
    %25 = arith.addf %20, %24 : vector<16x128xf32>
    %26 = arith.addf %25, %0 : vector<16x128xf32>
    %cst_14 = arith.constant dense<0.000000e+00> : vector<16x128xf32>
    %27 = tpu.matmul %5, %4, %cst_14 {dimension_numbers = #tpu.dot_dimension_numbers<[1], [0], [0], [1], [0, 0, 1, 1], [], []>} : vector<16x128xf32>, vector<128x128xf32>, vector<16x128xf32> -> vector<16x128xf32>
    %28 = arith.addf %27, %3 : vector<16x128xf32>
    %29 = math.tanh %28 : vector<16x128xf32>
    %30 = arith.index_cast %c0_i32 : i32 to index
    %31 = memref.load %arg0[%30] : memref<8xf32, #tpu.memory_space<smem>>
    %32 = arith.addf %26, %29 : vector<16x128xf32>
    %33 = vector.broadcast %31 : f32 to vector<16x128xf32>
    %34 = arith.mulf %33, %32 : vector<16x128xf32>
    %35 = arith.addf %5, %34 : vector<16x128xf32>
    %c1_i32_15 = arith.constant 1 : i32
    %36 = arith.index_cast %c1_i32_15 : i32 to index
    %c0_16 = arith.constant 0 : index
    %c0_17 = arith.constant 0 : index
    %37 = vector.load %arg7[%36, %c0_16, %c0_17] : memref<8x16x128xf32, #tpu.memory_space<vmem>>, vector<1x16x128xf32>
    %38 = vector.shape_cast %37 : vector<1x16x128xf32> to vector<16x128xf32>
    %39 = vector.shape_cast %35 : vector<16x128xf32> to vector<1x16x128xf32>
    tpu.vector_store %arg7[%36, %c0_16, %c0_17], %39 {strides = array<i32>} : memref<8x16x128xf32, #tpu.memory_space<vmem>>, vector<1x16x128xf32>,
    %c1_i32_18 = arith.constant 1 : i32
    %40 = tpu.dynamic_rotate %35 by %c1_i32_18 dim 0 : vector<16x128xf32>, i32 -> vector<16x128xf32>
    %c15_i32_19 = arith.constant 15 : i32
    %41 = tpu.dynamic_rotate %35 by %c15_i32_19 dim 0 : vector<16x128xf32>, i32 -> vector<16x128xf32>
    %42 = arith.addf %40, %41 : vector<16x128xf32>
    %c8_i32_20 = arith.constant 8 : i32
    %43 = tpu.dynamic_rotate %35 by %c8_i32_20 dim 1 : vector<16x128xf32>, i32 -> vector<16x128xf32>
    %44 = arith.addf %42, %43 : vector<16x128xf32>
    %c120_i32_21 = arith.constant 120 : i32
    %45 = tpu.dynamic_rotate %35 by %c120_i32_21 dim 1 : vector<16x128xf32>, i32 -> vector<16x128xf32>
    %46 = arith.addf %44, %45 : vector<16x128xf32>
    %cst_22 = arith.constant 4.000000e+00 : f32
    %47 = vector.broadcast %cst_22 : f32 to vector<16x128xf32>
    %48 = arith.mulf %47, %35 : vector<16x128xf32>
    %49 = arith.subf %46, %48 : vector<16x128xf32>
    %50 = arith.mulf %1, %49 : vector<16x128xf32>
    %cst_23 = arith.constant 1.000000e+00 : f32
    %51 = vector.broadcast %cst_23 : f32 to vector<16x128xf32>
    %52 = arith.subf %51, %35 : vector<16x128xf32>
    %53 = arith.mulf %35, %52 : vector<16x128xf32>
    %54 = arith.mulf %2, %53 : vector<16x128xf32>
    %55 = arith.addf %50, %54 : vector<16x128xf32>
    %56 = arith.addf %55, %0 : vector<16x128xf32>
    %cst_24 = arith.constant dense<0.000000e+00> : vector<16x128xf32>
    %57 = tpu.matmul %35, %4, %cst_24 {dimension_numbers = #tpu.dot_dimension_numbers<[1], [0], [0], [1], [0, 0, 1, 1], [], []>} : vector<16x128xf32>, vector<128x128xf32>, vector<16x128xf32> -> vector<16x128xf32>
    %58 = arith.addf %57, %3 : vector<16x128xf32>
    %59 = math.tanh %58 : vector<16x128xf32>
    %60 = arith.index_cast %c1_i32_15 : i32 to index
    %61 = memref.load %arg0[%60] : memref<8xf32, #tpu.memory_space<smem>>
    %62 = arith.addf %56, %59 : vector<16x128xf32>
    %63 = vector.broadcast %61 : f32 to vector<16x128xf32>
    %64 = arith.mulf %63, %62 : vector<16x128xf32>
    %65 = arith.addf %35, %64 : vector<16x128xf32>
    %c2_i32 = arith.constant 2 : i32
    %66 = arith.index_cast %c2_i32 : i32 to index
    %c0_25 = arith.constant 0 : index
    %c0_26 = arith.constant 0 : index
    %67 = vector.load %arg7[%66, %c0_25, %c0_26] : memref<8x16x128xf32, #tpu.memory_space<vmem>>, vector<1x16x128xf32>
    %68 = vector.shape_cast %67 : vector<1x16x128xf32> to vector<16x128xf32>
    %69 = vector.shape_cast %65 : vector<16x128xf32> to vector<1x16x128xf32>
    tpu.vector_store %arg7[%66, %c0_25, %c0_26], %69 {strides = array<i32>} : memref<8x16x128xf32, #tpu.memory_space<vmem>>, vector<1x16x128xf32>,
    %c1_i32_27 = arith.constant 1 : i32
    %70 = tpu.dynamic_rotate %65 by %c1_i32_27 dim 0 : vector<16x128xf32>, i32 -> vector<16x128xf32>
    %c15_i32_28 = arith.constant 15 : i32
    %71 = tpu.dynamic_rotate %65 by %c15_i32_28 dim 0 : vector<16x128xf32>, i32 -> vector<16x128xf32>
    %72 = arith.addf %70, %71 : vector<16x128xf32>
    %c8_i32_29 = arith.constant 8 : i32
    %73 = tpu.dynamic_rotate %65 by %c8_i32_29 dim 1 : vector<16x128xf32>, i32 -> vector<16x128xf32>
    %74 = arith.addf %72, %73 : vector<16x128xf32>
    %c120_i32_30 = arith.constant 120 : i32
    %75 = tpu.dynamic_rotate %65 by %c120_i32_30 dim 1 : vector<16x128xf32>, i32 -> vector<16x128xf32>
    %76 = arith.addf %74, %75 : vector<16x128xf32>
    %cst_31 = arith.constant 4.000000e+00 : f32
    %77 = vector.broadcast %cst_31 : f32 to vector<16x128xf32>
    %78 = arith.mulf %77, %65 : vector<16x128xf32>
    %79 = arith.subf %76, %78 : vector<16x128xf32>
    %80 = arith.mulf %1, %79 : vector<16x128xf32>
    %cst_32 = arith.constant 1.000000e+00 : f32
    %81 = vector.broadcast %cst_32 : f32 to vector<16x128xf32>
    %82 = arith.subf %81, %65 : vector<16x128xf32>
    %83 = arith.mulf %65, %82 : vector<16x128xf32>
    %84 = arith.mulf %2, %83 : vector<16x128xf32>
    %85 = arith.addf %80, %84 : vector<16x128xf32>
    %86 = arith.addf %85, %0 : vector<16x128xf32>
    %cst_33 = arith.constant dense<0.000000e+00> : vector<16x128xf32>
    %87 = tpu.matmul %65, %4, %cst_33 {dimension_numbers = #tpu.dot_dimension_numbers<[1], [0], [0], [1], [0, 0, 1, 1], [], []>} : vector<16x128xf32>, vector<128x128xf32>, vector<16x128xf32> -> vector<16x128xf32>
    %88 = arith.addf %87, %3 : vector<16x128xf32>
    %89 = math.tanh %88 : vector<16x128xf32>
    %90 = arith.index_cast %c2_i32 : i32 to index
    %91 = memref.load %arg0[%90] : memref<8xf32, #tpu.memory_space<smem>>
    %92 = arith.addf %86, %89 : vector<16x128xf32>
    %93 = vector.broadcast %91 : f32 to vector<16x128xf32>
    %94 = arith.mulf %93, %92 : vector<16x128xf32>
    %95 = arith.addf %65, %94 : vector<16x128xf32>
    %c3_i32 = arith.constant 3 : i32
    %96 = arith.index_cast %c3_i32 : i32 to index
    %c0_34 = arith.constant 0 : index
    %c0_35 = arith.constant 0 : index
    %97 = vector.load %arg7[%96, %c0_34, %c0_35] : memref<8x16x128xf32, #tpu.memory_space<vmem>>, vector<1x16x128xf32>
    %98 = vector.shape_cast %97 : vector<1x16x128xf32> to vector<16x128xf32>
    %99 = vector.shape_cast %95 : vector<16x128xf32> to vector<1x16x128xf32>
    tpu.vector_store %arg7[%96, %c0_34, %c0_35], %99 {strides = array<i32>} : memref<8x16x128xf32, #tpu.memory_space<vmem>>, vector<1x16x128xf32>,
    %c1_i32_36 = arith.constant 1 : i32
    %100 = tpu.dynamic_rotate %95 by %c1_i32_36 dim 0 : vector<16x128xf32>, i32 -> vector<16x128xf32>
    %c15_i32_37 = arith.constant 15 : i32
    %101 = tpu.dynamic_rotate %95 by %c15_i32_37 dim 0 : vector<16x128xf32>, i32 -> vector<16x128xf32>
    %102 = arith.addf %100, %101 : vector<16x128xf32>
    %c8_i32_38 = arith.constant 8 : i32
    %103 = tpu.dynamic_rotate %95 by %c8_i32_38 dim 1 : vector<16x128xf32>, i32 -> vector<16x128xf32>
    %104 = arith.addf %102, %103 : vector<16x128xf32>
    %c120_i32_39 = arith.constant 120 : i32
    %105 = tpu.dynamic_rotate %95 by %c120_i32_39 dim 1 : vector<16x128xf32>, i32 -> vector<16x128xf32>
    %106 = arith.addf %104, %105 : vector<16x128xf32>
    %cst_40 = arith.constant 4.000000e+00 : f32
    %107 = vector.broadcast %cst_40 : f32 to vector<16x128xf32>
    %108 = arith.mulf %107, %95 : vector<16x128xf32>
    %109 = arith.subf %106, %108 : vector<16x128xf32>
    %110 = arith.mulf %1, %109 : vector<16x128xf32>
    %cst_41 = arith.constant 1.000000e+00 : f32
    %111 = vector.broadcast %cst_41 : f32 to vector<16x128xf32>
    %112 = arith.subf %111, %95 : vector<16x128xf32>
    %113 = arith.mulf %95, %112 : vector<16x128xf32>
    %114 = arith.mulf %2, %113 : vector<16x128xf32>
    %115 = arith.addf %110, %114 : vector<16x128xf32>
    %116 = arith.addf %115, %0 : vector<16x128xf32>
    %cst_42 = arith.constant dense<0.000000e+00> : vector<16x128xf32>
    %117 = tpu.matmul %95, %4, %cst_42 {dimension_numbers = #tpu.dot_dimension_numbers<[1], [0], [0], [1], [0, 0, 1, 1], [], []>} : vector<16x128xf32>, vector<128x128xf32>, vector<16x128xf32> -> vector<16x128xf32>
    %118 = arith.addf %117, %3 : vector<16x128xf32>
    %119 = math.tanh %118 : vector<16x128xf32>
    %120 = arith.index_cast %c3_i32 : i32 to index
    %121 = memref.load %arg0[%120] : memref<8xf32, #tpu.memory_space<smem>>
    %122 = arith.addf %116, %119 : vector<16x128xf32>
    %123 = vector.broadcast %121 : f32 to vector<16x128xf32>
    %124 = arith.mulf %123, %122 : vector<16x128xf32>
    %125 = arith.addf %95, %124 : vector<16x128xf32>
    %c4_i32 = arith.constant 4 : i32
    %126 = arith.index_cast %c4_i32 : i32 to index
    %c0_43 = arith.constant 0 : index
    %c0_44 = arith.constant 0 : index
    %127 = vector.load %arg7[%126, %c0_43, %c0_44] : memref<8x16x128xf32, #tpu.memory_space<vmem>>, vector<1x16x128xf32>
    %128 = vector.shape_cast %127 : vector<1x16x128xf32> to vector<16x128xf32>
    %129 = vector.shape_cast %125 : vector<16x128xf32> to vector<1x16x128xf32>
    tpu.vector_store %arg7[%126, %c0_43, %c0_44], %129 {strides = array<i32>} : memref<8x16x128xf32, #tpu.memory_space<vmem>>, vector<1x16x128xf32>,
    %c1_i32_45 = arith.constant 1 : i32
    %130 = tpu.dynamic_rotate %125 by %c1_i32_45 dim 0 : vector<16x128xf32>, i32 -> vector<16x128xf32>
    %c15_i32_46 = arith.constant 15 : i32
    %131 = tpu.dynamic_rotate %125 by %c15_i32_46 dim 0 : vector<16x128xf32>, i32 -> vector<16x128xf32>
    %132 = arith.addf %130, %131 : vector<16x128xf32>
    %c8_i32_47 = arith.constant 8 : i32
    %133 = tpu.dynamic_rotate %125 by %c8_i32_47 dim 1 : vector<16x128xf32>, i32 -> vector<16x128xf32>
    %134 = arith.addf %132, %133 : vector<16x128xf32>
    %c120_i32_48 = arith.constant 120 : i32
    %135 = tpu.dynamic_rotate %125 by %c120_i32_48 dim 1 : vector<16x128xf32>, i32 -> vector<16x128xf32>
    %136 = arith.addf %134, %135 : vector<16x128xf32>
    %cst_49 = arith.constant 4.000000e+00 : f32
    %137 = vector.broadcast %cst_49 : f32 to vector<16x128xf32>
    %138 = arith.mulf %137, %125 : vector<16x128xf32>
    %139 = arith.subf %136, %138 : vector<16x128xf32>
    %140 = arith.mulf %1, %139 : vector<16x128xf32>
    %cst_50 = arith.constant 1.000000e+00 : f32
    %141 = vector.broadcast %cst_50 : f32 to vector<16x128xf32>
    %142 = arith.subf %141, %125 : vector<16x128xf32>
    %143 = arith.mulf %125, %142 : vector<16x128xf32>
    %144 = arith.mulf %2, %143 : vector<16x128xf32>
    %145 = arith.addf %140, %144 : vector<16x128xf32>
    %146 = arith.addf %145, %0 : vector<16x128xf32>
    %cst_51 = arith.constant dense<0.000000e+00> : vector<16x128xf32>
    %147 = tpu.matmul %125, %4, %cst_51 {dimension_numbers = #tpu.dot_dimension_numbers<[1], [0], [0], [1], [0, 0, 1, 1], [], []>} : vector<16x128xf32>, vector<128x128xf32>, vector<16x128xf32> -> vector<16x128xf32>
    %148 = arith.addf %147, %3 : vector<16x128xf32>
    %149 = math.tanh %148 : vector<16x128xf32>
    %150 = arith.index_cast %c4_i32 : i32 to index
    %151 = memref.load %arg0[%150] : memref<8xf32, #tpu.memory_space<smem>>
    %152 = arith.addf %146, %149 : vector<16x128xf32>
    %153 = vector.broadcast %151 : f32 to vector<16x128xf32>
    %154 = arith.mulf %153, %152 : vector<16x128xf32>
    %155 = arith.addf %125, %154 : vector<16x128xf32>
    %c5_i32 = arith.constant 5 : i32
    %156 = arith.index_cast %c5_i32 : i32 to index
    %c0_52 = arith.constant 0 : index
    %c0_53 = arith.constant 0 : index
    %157 = vector.load %arg7[%156, %c0_52, %c0_53] : memref<8x16x128xf32, #tpu.memory_space<vmem>>, vector<1x16x128xf32>
    %158 = vector.shape_cast %157 : vector<1x16x128xf32> to vector<16x128xf32>
    %159 = vector.shape_cast %155 : vector<16x128xf32> to vector<1x16x128xf32>
    tpu.vector_store %arg7[%156, %c0_52, %c0_53], %159 {strides = array<i32>} : memref<8x16x128xf32, #tpu.memory_space<vmem>>, vector<1x16x128xf32>,
    %c1_i32_54 = arith.constant 1 : i32
    %160 = tpu.dynamic_rotate %155 by %c1_i32_54 dim 0 : vector<16x128xf32>, i32 -> vector<16x128xf32>
    %c15_i32_55 = arith.constant 15 : i32
    %161 = tpu.dynamic_rotate %155 by %c15_i32_55 dim 0 : vector<16x128xf32>, i32 -> vector<16x128xf32>
    %162 = arith.addf %160, %161 : vector<16x128xf32>
    %c8_i32_56 = arith.constant 8 : i32
    %163 = tpu.dynamic_rotate %155 by %c8_i32_56 dim 1 : vector<16x128xf32>, i32 -> vector<16x128xf32>
    %164 = arith.addf %162, %163 : vector<16x128xf32>
    %c120_i32_57 = arith.constant 120 : i32
    %165 = tpu.dynamic_rotate %155 by %c120_i32_57 dim 1 : vector<16x128xf32>, i32 -> vector<16x128xf32>
    %166 = arith.addf %164, %165 : vector<16x128xf32>
    %cst_58 = arith.constant 4.000000e+00 : f32
    %167 = vector.broadcast %cst_58 : f32 to vector<16x128xf32>
    %168 = arith.mulf %167, %155 : vector<16x128xf32>
    %169 = arith.subf %166, %168 : vector<16x128xf32>
    %170 = arith.mulf %1, %169 : vector<16x128xf32>
    %cst_59 = arith.constant 1.000000e+00 : f32
    %171 = vector.broadcast %cst_59 : f32 to vector<16x128xf32>
    %172 = arith.subf %171, %155 : vector<16x128xf32>
    %173 = arith.mulf %155, %172 : vector<16x128xf32>
    %174 = arith.mulf %2, %173 : vector<16x128xf32>
    %175 = arith.addf %170, %174 : vector<16x128xf32>
    %176 = arith.addf %175, %0 : vector<16x128xf32>
    %cst_60 = arith.constant dense<0.000000e+00> : vector<16x128xf32>
    %177 = tpu.matmul %155, %4, %cst_60 {dimension_numbers = #tpu.dot_dimension_numbers<[1], [0], [0], [1], [0, 0, 1, 1], [], []>} : vector<16x128xf32>, vector<128x128xf32>, vector<16x128xf32> -> vector<16x128xf32>
    %178 = arith.addf %177, %3 : vector<16x128xf32>
    %179 = math.tanh %178 : vector<16x128xf32>
    %180 = arith.index_cast %c5_i32 : i32 to index
    %181 = memref.load %arg0[%180] : memref<8xf32, #tpu.memory_space<smem>>
    %182 = arith.addf %176, %179 : vector<16x128xf32>
    %183 = vector.broadcast %181 : f32 to vector<16x128xf32>
    %184 = arith.mulf %183, %182 : vector<16x128xf32>
    %185 = arith.addf %155, %184 : vector<16x128xf32>
    %c6_i32 = arith.constant 6 : i32
    %186 = arith.index_cast %c6_i32 : i32 to index
    %c0_61 = arith.constant 0 : index
    %c0_62 = arith.constant 0 : index
    %187 = vector.load %arg7[%186, %c0_61, %c0_62] : memref<8x16x128xf32, #tpu.memory_space<vmem>>, vector<1x16x128xf32>
    %188 = vector.shape_cast %187 : vector<1x16x128xf32> to vector<16x128xf32>
    %189 = vector.shape_cast %185 : vector<16x128xf32> to vector<1x16x128xf32>
    tpu.vector_store %arg7[%186, %c0_61, %c0_62], %189 {strides = array<i32>} : memref<8x16x128xf32, #tpu.memory_space<vmem>>, vector<1x16x128xf32>,
    %c1_i32_63 = arith.constant 1 : i32
    %190 = tpu.dynamic_rotate %185 by %c1_i32_63 dim 0 : vector<16x128xf32>, i32 -> vector<16x128xf32>
    %c15_i32_64 = arith.constant 15 : i32
    %191 = tpu.dynamic_rotate %185 by %c15_i32_64 dim 0 : vector<16x128xf32>, i32 -> vector<16x128xf32>
    %192 = arith.addf %190, %191 : vector<16x128xf32>
    %c8_i32_65 = arith.constant 8 : i32
    %193 = tpu.dynamic_rotate %185 by %c8_i32_65 dim 1 : vector<16x128xf32>, i32 -> vector<16x128xf32>
    %194 = arith.addf %192, %193 : vector<16x128xf32>
    %c120_i32_66 = arith.constant 120 : i32
    %195 = tpu.dynamic_rotate %185 by %c120_i32_66 dim 1 : vector<16x128xf32>, i32 -> vector<16x128xf32>
    %196 = arith.addf %194, %195 : vector<16x128xf32>
    %cst_67 = arith.constant 4.000000e+00 : f32
    %197 = vector.broadcast %cst_67 : f32 to vector<16x128xf32>
    %198 = arith.mulf %197, %185 : vector<16x128xf32>
    %199 = arith.subf %196, %198 : vector<16x128xf32>
    %200 = arith.mulf %1, %199 : vector<16x128xf32>
    %cst_68 = arith.constant 1.000000e+00 : f32
    %201 = vector.broadcast %cst_68 : f32 to vector<16x128xf32>
    %202 = arith.subf %201, %185 : vector<16x128xf32>
    %203 = arith.mulf %185, %202 : vector<16x128xf32>
    %204 = arith.mulf %2, %203 : vector<16x128xf32>
    %205 = arith.addf %200, %204 : vector<16x128xf32>
    %206 = arith.addf %205, %0 : vector<16x128xf32>
    %cst_69 = arith.constant dense<0.000000e+00> : vector<16x128xf32>
    %207 = tpu.matmul %185, %4, %cst_69 {dimension_numbers = #tpu.dot_dimension_numbers<[1], [0], [0], [1], [0, 0, 1, 1], [], []>} : vector<16x128xf32>, vector<128x128xf32>, vector<16x128xf32> -> vector<16x128xf32>
    %208 = arith.addf %207, %3 : vector<16x128xf32>
    %209 = math.tanh %208 : vector<16x128xf32>
    %210 = arith.index_cast %c6_i32 : i32 to index
    %211 = memref.load %arg0[%210] : memref<8xf32, #tpu.memory_space<smem>>
    %212 = arith.addf %206, %209 : vector<16x128xf32>
    %213 = vector.broadcast %211 : f32 to vector<16x128xf32>
    %214 = arith.mulf %213, %212 : vector<16x128xf32>
    %215 = arith.addf %185, %214 : vector<16x128xf32>
    %c7_i32 = arith.constant 7 : i32
    %c7 = arith.constant 7 : index
    %c0_70 = arith.constant 0 : index
    %c0_71 = arith.constant 0 : index
    %216 = vector.load %arg7[%c7, %c0_70, %c0_71] : memref<8x16x128xf32, #tpu.memory_space<vmem>>, vector<1x16x128xf32>
    %217 = vector.shape_cast %216 : vector<1x16x128xf32> to vector<16x128xf32>
    %218 = vector.shape_cast %215 : vector<16x128xf32> to vector<1x16x128xf32>
    tpu.vector_store %arg7[%c7, %c0_70, %c0_71], %218 {strides = array<i32>} : memref<8x16x128xf32, #tpu.memory_space<vmem>>, vector<1x16x128xf32>,
    return
  }
}

</mosaic_0001>

<bundles_post_ra>
// kernel: tpu_custom_call.1
= control target key start
LH: loop header
LB: loop body
LE: loop exit
PB: predicated region body
PF: predicated region fallthrough
CT: control target
= control target key end

     0   :  { %12 = vsyncpa [#allocation5], 0  ;;  %s2263_s0 = inlined_call_operand.hbm [shape: f32[8], index: 0, kind: input, shape index: {}]   ;;  %s2264_s1 = inlined_call_operand.hbm [shape: f32[16,128], index: 1, kind: input, shape index: {}]   ;;  %s2265_s2 = inlined_call_operand.hbm [shape: f32[16,128], index: 2, kind: input, shape index: {}]   ;;  %s2266_s3 = inlined_call_operand.hbm [shape: f32[16,128], index: 3, kind: input, shape index: {}]   ;;  %s2267_s4 = inlined_call_operand.hbm [shape: f32[16,128], index: 4, kind: input, shape index: {}]   ;;  %s2268_s5 = inlined_call_operand.hbm [shape: f32[16,128], index: 5, kind: input, shape index: {}]   ;;  %s2269_s6 = inlined_call_operand.hbm [shape: f32[128,128], index: 6, kind: input, shape index: {}]   ;;  %s2270_s7 = inlined_call_operand.hbm [shape: f32[8,16,128], index: 7, kind: output, shape index: {}]  }
   0x1   :  { %13 = vsyncpa [#allocation3], 0 }
   0x2   :  { %14 = vsyncpa [#allocation8], 0 }
   0x3   :  { %15 = vsyncpa [#allocation11], 0 }
   0x4   :  { %16 = vsyncpa [#allocation14], 0 }
   0x5   :  { %17 = vsyncpa [#allocation4], 0  ;;  %s1631_s24 = smov [#allocation7]   ;;  %s1632_s26 = smov [#allocation10]  }
   0x6   :  { %s43_s25 = sshll.u32 %s1631_s24, 4  ;;  %s67_s27 = sshll.u32 %s1632_s26, 4  ;;  %s44_s25 = int_to_ptr.vmem [resolvable:$true] %s43_s25  ;;  %s68_s27 = int_to_ptr.vmem [resolvable:$true] %s67_s27 }
   0x7   :  { %s1479_s28 = scalar_lea.vmem %s44_s25, 256  ;;  %p1484_p1 = scmp.lt.s32.totalorder %s44_s25, %s44_s25 }
   0x8   :  { %p1480_p0 = scmp.ne.s32.totalorder %s44_s25, %s1479_s28  ;;  %p1485_p2 = scmp.lt.s32.totalorder %s1479_s28, %s1479_s28 }
   0xa   :  { %p1486_p3 = por %p1485_p2, %p1484_p1 }
   0xc   :  { %p1487_p4 = pnand %p1486_p3, %p1480_p0 }
   0xe   :  { %1490 = shalt.err (!%p1487_p4)
}
   0xf   :  { %s1633_s29 = smov 128   ;;  %s1634_s30 = smov 8  }
  0x10   :  { %49 = dma.hbm_to_vmem [thread:$0]  %s2265_s2, 256, %s44_s25, [#allocation8], %s1633_s29, %s1633_s29, %s1634_s30  }
  0x11   :  { %s1499_s10 = scalar_lea.vmem %s68_s27, 256  ;;  %p1504_p6 = scmp.lt.s32.totalorder %s68_s27, %s68_s27 }
  0x12   :  { %p1500_p5 = scmp.ne.s32.totalorder %s68_s27, %s1499_s10  ;;  %p1505_p7 = scmp.lt.s32.totalorder %s1499_s10, %s1499_s10 }
  0x14   :  { %p1506_p8 = por %p1505_p7, %p1504_p6 }
  0x16   :  { %p1507_p9 = pnand %p1506_p8, %p1500_p5 }
  0x18   :  { %1510 = shalt.err (!%p1507_p9)
}
  0x19   :  { %73 = dma.hbm_to_vmem [thread:$0]  %s2267_s4, 256, %s68_s27, [#allocation11], %s1633_s29, %s1633_s29, %s1634_s30  }
  0x1a   :  { %s1635_s13 = smov [#allocation2]   ;;  %s1636_s2 = smov [#allocation6]  }
  0x1b   :  { %25 = dma.hbm_to_smem %s2263_s0, 16, %s1635_s13, [#allocation5]  }
  0x1c   :  { %s31_s16 = sshll.u32 %s1636_s2, 4  ;;  %s1637_s17 = smov [#allocation9]   ;;  %s32_s16 = int_to_ptr.vmem [resolvable:$true] %s31_s16 }
  0x1d   :  { %s55_s18 = sshll.u32 %s1637_s17, 4  ;;  %s1527_s19 = scalar_lea.vmem %s32_s16, 256  ;;  %s56_s18 = int_to_ptr.vmem [resolvable:$true] %s55_s18 }
  0x1e   :  { %p1528_p10 = scmp.ne.s32.totalorder %s32_s16, %s1527_s19  ;;  %p1532_p11 = scmp.lt.s32.totalorder %s32_s16, %s32_s16 }
  0x1f   :  { %p1533_p12 = scmp.lt.s32.totalorder %s1527_s19, %s1527_s19 }
  0x21   :  { %p1534_p13 = por %p1533_p12, %p1532_p11 }
  0x23   :  { %p1535_p0 = pnand %p1534_p13, %p1528_p10 }
  0x25   :  { %1538 = shalt.err (!%p1535_p0)
}
  0x26   :  { %37 = dma.hbm_to_vmem [thread:$0]  %s2264_s1, 256, %s32_s16, [#allocation3], %s1633_s29, %s1633_s29, %s1634_s30  }
  0x27   :  { %s1547_s0 = scalar_lea.vmem %s56_s18, 256  ;;  %p1552_p2 = scmp.lt.s32.totalorder %s56_s18, %s56_s18 }
  0x28   :  { %p1548_p1 = scmp.ne.s32.totalorder %s56_s18, %s1547_s0  ;;  %p1553_p3 = scmp.lt.s32.totalorder %s1547_s0, %s1547_s0 }
  0x2a   :  { %p1554_p4 = por %p1553_p3, %p1552_p2 }
  0x2c   :  { %p1555_p5 = pnand %p1554_p4, %p1548_p1 }
  0x2e   :  { %1558 = shalt.err (!%p1555_p5)
}
  0x2f   :  { %61 = dma.hbm_to_vmem [thread:$0]  %s2266_s3, 256, %s56_s18, [#allocation8], %s1633_s29, %s1633_s29, %s1634_s30  }
  0x30   :  { %s1638_s23 = smov [#allocation12]   ;;  %s1639_s25 = smov [#allocation13]  }
  0x31   :  { %s79_s24 = sshll.u32 %s1638_s23, 4  ;;  %s91_s1 = sshll.u32 %s1639_s25, 4  ;;  %s80_s24 = int_to_ptr.vmem [resolvable:$true] %s79_s24  ;;  %s92_s1 = int_to_ptr.vmem [resolvable:$true] %s91_s1 }
  0x32   :  { %s1567_s26 = scalar_lea.vmem %s80_s24, 256  ;;  %p1572_p7 = scmp.lt.s32.totalorder %s80_s24, %s80_s24 }
  0x33   :  { %p1568_p6 = scmp.ne.s32.totalorder %s80_s24, %s1567_s26  ;;  %p1573_p8 = scmp.lt.s32.totalorder %s1567_s26, %s1567_s26 }
  0x35   :  { %p1574_p9 = por %p1573_p8, %p1572_p7 }
  0x37   :  { %p1575_p10 = pnand %p1574_p9, %p1568_p6 }
  0x39   :  { %1578 = shalt.err (!%p1575_p10)
}
  0x3a   :  { %85 = dma.hbm_to_vmem [thread:$0]  %s2268_s5, 256, %s80_s24, [#allocation11], %s1633_s29, %s1633_s29, %s1634_s30  }
  0x3b   :  { %s1587_s3 = scalar_lea.vmem %s92_s1, 2048  ;;  %p1592_p12 = scmp.lt.s32.totalorder %s92_s1, %s92_s1 }
  0x3c   :  { %p1588_p11 = scmp.ne.s32.totalorder %s92_s1, %s1587_s3  ;;  %p1593_p13 = scmp.lt.s32.totalorder %s1587_s3, %s1587_s3 }
  0x3e   :  { %p1594_p0 = por %p1593_p13, %p1592_p12 }
  0x40   :  { %p1595_p1 = pnand %p1594_p0, %p1588_p11 }
  0x42   :  { %1598 = shalt.err (!%p1595_p1)
}
  0x43   :  { %97 = dma.hbm_to_vmem [thread:$0]  %s2269_s6, 2048, %s92_s1, [#allocation14], %s1633_s29, %s1633_s29, %s1634_s30  }
  0x44   :  { %1619 = dma.done.wait [#allocation5], 16  }
  0x45   :  { %1620 = vsyncadd [#allocation5], 4294967280 }
  0x46   :  { %1621 = dma.done.wait [#allocation3], 256  }
  0x47   :  { %1622 = vsyncadd [#allocation3], 4294967040 }
  0x48   :  { %1623 = dma.done.wait [#allocation8], 512  }
  0x49   :  { %1624 = vsyncadd [#allocation8], 4294966784 }
  0x4a   :  { %1625 = dma.done.wait [#allocation11], 512  }
  0x4b   :  { %1626 = vsyncadd [#allocation11], 4294966784 }
  0x4c   :  { %1627 = dma.done.wait [#allocation14], 2048  }
  0x4d   :  { %1628 = vsyncadd [#allocation14], 4294965248 }
  0x4e   :  { %119 = sfence }
  0x4f   :  { %v1721_v0 = vld [vmem:[#allocation13 + $0x78] sm:$0xff]  ;;  %v1723_v1 = vld [vmem:[#allocation13 + $0x70] sm:$0xff]  ;;  %v1728_v2 = vld [vmem:[#allocation13 + $0x68] sm:$0xff]  ;;  %s1640_s5 = smov 120   ;;  %v150_v18 = vlaneseq  ;;  %s267_s6 = sld [smem:[#allocation2]] }
  0x50   :  { %1187 = vmatprep.subr.mxu0 %v1721_v0  ;;  %1222 = vmatprep.subr.mxu1 %v1721_v0  ;;  %v1734_v3 = vld [vmem:[#allocation13 + $0x60] sm:$0xff]  ;;  %v1738_v4 = vld [vmem:[#allocation6] sm:$0xff]  ;;  %v1740_v5 = vld [vmem:[#allocation6 + $0x8] sm:$0xff]  ;;  %s1055_s10 = sld [smem:[#allocation2 + $0x1]]  ;;  %s1641_s2 = smov [#allocation15]  }
  0x51   :  { %1188 = vmatpush3.msra.mxu0 %v1721_v0  ;;  %1223 = vmatpush3.msra.mxu1 %v1721_v0  ;;  %v1744_v6 = vld [vmem:[#allocation13 + $0x58] sm:$0xff]  ;;  %146 = vst [vmem:[#allocation15] sm:$0xff] %v1738_v4  ;;  %147 = vst [vmem:[#allocation15 + $0x8] sm:$0xff] %v1740_v5  ;;  %v1753_v7 = vld [vmem:[#allocation13 + $0x50] sm:$0xff]  ;;  %v1867_v19 = vshrl.u32 %v150_v18, 7  ;;  %v149_v20 = vrot.slane %v1740_v5, 7 }
  0x52   :  { %1189 = vmatprep.subr.mxu0 %v1723_v1  ;;  %1224 = vmatprep.subr.mxu1 %v1723_v1  ;;  %v1760_v8 = vld [vmem:[#allocation13 + $0x48] sm:$0xff]  ;;  %v1767_v9 = vld [vmem:[#allocation13 + $0x40] sm:$0xff]  ;;  %v1774_v10 = vld [vmem:[#allocation13 + $0x38] sm:$0xff]  ;;  %v156_v21 = vrot.slane %v1740_v5, 1  ;;  %v148_v22 = vrot.slane %v1738_v4, 7  ;;  %v155_v23 = vrot.slane %v1738_v4, 1 }
  0x53   :  { %1190 = vmatpush3.msra.mxu0 %v1723_v1  ;;  %1225 = vmatpush3.msra.mxu1 %v1723_v1  ;;  %v1780_v11 = vld [vmem:[#allocation13 + $0x30] sm:$0xff]  ;;  %v1786_v12 = vld [vmem:[#allocation13 + $0x28] sm:$0xff]  ;;  %v1792_v13 = vld [vmem:[#allocation13 + $0x20] sm:$0xff]  ;;  %vm152_vm0 = vcmp.lt.s32.totalorder %v1867_v19, 1  ;;  %vm157_vm1 = vcmp.lt.s32.totalorder %v1867_v19, 7  ;;  %v175_v36 = vmul.f32 4.0, %v1740_v5 }
  0x54   :  { %1191 = vmatprep.subr.mxu0 %v1728_v2  ;;  %1226 = vmatprep.subr.mxu1 %v1728_v2  ;;  %v1798_v14 = vld [vmem:[#allocation13 + $0x18] sm:$0xff]  ;;  %v1804_v15 = vld [vmem:[#allocation13 + $0x10] sm:$0xff]  ;;  %v1810_v16 = vld [vmem:[#allocation13 + $0x8] sm:$0xff]  ;;  %v153_v25 = vsel %vm152_vm0, %v148_v22, %v149_v20  ;;  %v159_v26 = vsel %vm157_vm1, %v156_v21, %v155_v23  ;;  %v154_v29 = vsel %vm152_vm0, %v149_v20, %v148_v22  ;;  %v181_v37 = vsub.f32 1.0, %v1740_v5  ;;  %s1056_s11 = sld [smem:[#allocation2 + $0x2]]  ;;  %s1039_s16 = sshll.u32 %s1641_s2, 4  ;;  %s1040_s16 = int_to_ptr.vmem [resolvable:$true] %s1039_s16 }
  0x55   :  { %1192 = vmatpush3.msra.mxu0 %v1728_v2  ;;  %1219 = vmatprep.mubr.f32.mxu0 %v1738_v4  ;;  %v1816_v17 = vld [vmem:[#allocation13] sm:$0xff]  ;;  %v161_v28 = vadd.f32 %v159_v26, %v153_v25  ;;  %v158_v30 = vsel %vm157_vm1, %v155_v23, %v156_v21  ;;  %v1885_v39 = vld [vmem:[#allocation12 + $0x8] sm:$0xff]  ;;  %v174_v41 = vmul.f32 4.0, %v1738_v4  ;;  %v180_v42 = vsub.f32 1.0, %v1738_v4  ;;  %v1889_v43 = vld [vmem:[#allocation12] sm:$0xff]  ;;  %s1057_s12 = sld [smem:[#allocation2 + $0x3]]  ;;  %p1604_p3 = scmp.lt.s32.totalorder %s1040_s16, %s1040_s16 }
  0x56   :  { %1193 = vmatprep.subr.mxu0 %v1734_v3  ;;  %162 = vrot.lane.b32.xlu0 %v1738_v4, %s1634_s30  ;;  %v160_v32 = vadd.f32 %v158_v30, %v154_v29  ;;  %v183_v46 = vmul.f32 %v181_v37, %v1740_v5  ;;  %v1893_v49 = vld [vmem:[#allocation9 + $0x8] sm:$0xff]  ;;  %v1895_v50 = vld [vmem:[#allocation10 + $0x8] sm:$0xff]  ;;  %v1901_v56 = vld [vmem:[#allocation9] sm:$0xff]  ;;  %v270_v21 = vstv %s267_s6  ;;  %s1058_s13 = sld [smem:[#allocation2 + $0x4]]  ;;  %s1599_s17 = scalar_lea.vmem %s1040_s16, 2048 }
  0x57   :  { %1194 = vmatpush3.msra.mxu0 %v1734_v3  ;;  %168 = vrot.lane.b32.xlu1 %v1738_v4, %s1640_s5  ;;  %v182_v52 = vmul.f32 %v180_v42, %v1738_v4  ;;  %v1903_v57 = vld [vmem:[#allocation10] sm:$0xff]  ;;  %v1907_v61 = vld [vmem:[#allocation7 + $0x8] sm:$0xff]  ;;  %s1059_s14 = sld [smem:[#allocation2 + $0x5]]  ;;  %p1600_p2 = scmp.ne.s32.totalorder %s1040_s16, %s1599_s17 }
  0x58   :  { %1195 = vmatprep.subr.mxu0 %v1744_v6  ;;  %1227 = vmatpush3.msra.mxu1 %v1728_v2  ;;  %v185_v55 = vmul.f32 %v183_v46, %v1895_v50  ;;  %v1910_v18 = vld [vmem:[#allocation7] sm:$0xff]  ;;  %s1060_s15 = sld [smem:[#allocation2 + $0x6]]  ;;  %p1605_p4 = scmp.lt.s32.totalorder %s1599_s17, %s1599_s17 }
  0x59   :  { %1196 = vmatpush3.msra.mxu0 %v1744_v6  ;;  %1228 = vmatprep.subr.mxu1 %v1734_v3  ;;  %v184_v59 = vmul.f32 %v182_v52, %v1903_v57 }
  0x5a   :  { %1197 = vmatprep.subr.mxu0 %v1753_v7  ;;  %164 = vrot.lane.b32.xlu0 %v1740_v5, %s1634_s30  ;;  %p1606_p5 = por %p1605_p4, %p1604_p3 }
  0x5b   :  { %1198 = vmatpush3.msra.mxu0 %v1753_v7  ;;  %170 = vrot.lane.b32.xlu1 %v1740_v5, %s1640_s5 }
  0x5c   :  { %1199 = vmatprep.subr.mxu0 %v1760_v8  ;;  %1229 = vmatpush3.msra.mxu1 %v1734_v3  ;;  %p1607_p6 = pnand %p1606_p5, %p1600_p2 }
  0x5d   :  { %1200 = vmatpush3.msra.mxu0 %v1760_v8  ;;  %1230 = vmatprep.subr.mxu1 %v1744_v6 }
  0x5e   :  { %1201 = vmatprep.subr.mxu0 %v1767_v9  ;;  %1231 = vmatpush3.msra.mxu1 %v1744_v6 }
  0x5f   :  { %1202 = vmatpush3.msra.mxu0 %v1767_v9  ;;  %1232 = vmatprep.subr.mxu1 %v1753_v7 }
  0x60   :  { %1203 = vmatprep.subr.mxu0 %v1774_v10  ;;  %1233 = vmatpush3.msra.mxu1 %v1753_v7 }
  0x61   :  { %1204 = vmatpush3.msra.mxu0 %v1774_v10  ;;  %1234 = vmatprep.subr.mxu1 %v1760_v8 }
  0x62   :  { %1205 = vmatprep.subr.mxu0 %v1780_v11  ;;  %1235 = vmatpush3.msra.mxu1 %v1760_v8 }
  0x63   :  { %1206 = vmatpush3.msra.mxu0 %v1780_v11  ;;  %1236 = vmatprep.subr.mxu1 %v1767_v9 }
  0x64   :  { %1207 = vmatprep.subr.mxu0 %v1786_v12  ;;  %1237 = vmatpush3.msra.mxu1 %v1767_v9 }
  0x65   :  { %1208 = vmatpush3.msra.mxu0 %v1786_v12  ;;  %1238 = vmatprep.subr.mxu1 %v1774_v10 }
  0x66   :  { %1209 = vmatprep.subr.mxu0 %v1792_v13  ;;  %1239 = vmatpush3.msra.mxu1 %v1774_v10 }
  0x67   :  { %1210 = vmatpush3.msra.mxu0 %v1792_v13  ;;  %1240 = vmatprep.subr.mxu1 %v1780_v11 }
  0x68   :  { %1211 = vmatprep.subr.mxu0 %v1798_v14  ;;  %1241 = vmatpush3.msra.mxu1 %v1780_v11 }
  0x69   :  { %1212 = vmatpush3.msra.mxu0 %v1798_v14  ;;  %1242 = vmatprep.subr.mxu1 %v1786_v12 }
  0x6a   :  { %1213 = vmatprep.subr.mxu0 %v1804_v15  ;;  %1243 = vmatpush3.msra.mxu1 %v1786_v12 }
  0x6b   :  { %1214 = vmatpush3.msra.mxu0 %v1804_v15  ;;  %1244 = vmatprep.subr.mxu1 %v1792_v13 }
  0x6c   :  { %1215 = vmatprep.subr.mxu0 %v1810_v16  ;;  %1245 = vmatpush3.msra.mxu1 %v1792_v13 }
  0x6d   :  { %1216 = vmatpush3.msra.mxu0 %v1810_v16  ;;  %1246 = vmatprep.subr.mxu1 %v1798_v14 }
  0x6e   :  { %1217 = vmatprep.subr.mxu0 %v1816_v17  ;;  %1247 = vmatpush3.msra.mxu1 %v1798_v14 }
  0x6f   :  { %1218 = vmatpush3.msra.mxu0 %v1816_v17  ;;  %1248 = vmatprep.subr.mxu1 %v1804_v15 }
  0x70   :  { %1220 = vmatmul.mubr.f32.vlgmr.msra.gmra.mxu0 %v1740_v5  ;;  %1249 = vmatpush3.msra.mxu1 %v1804_v15 }
  0x71   :  { %1250 = vmatprep.subr.mxu1 %v1810_v16  ;;  %1257 = vmatprep.subr.mxu0 %v1721_v0 }
  0x72   :  { %1251 = vmatpush3.msra.mxu1 %v1810_v16  ;;  %1258 = vmatpush3.msra.mxu0 %v1721_v0 }
  0x73   :  { %1252 = vmatprep.subr.mxu1 %v1816_v17  ;;  %1259 = vmatprep.subr.mxu0 %v1723_v1 }
  0x74   :  { %1253 = vmatpush3.msra.mxu1 %v1816_v17  ;;  %1260 = vmatpush3.msra.mxu0 %v1723_v1 }
  0x75   :  { %1261 = vmatprep.subr.mxu0 %v1728_v2  ;;  %1292 = vmatprep.subr.mxu1 %v1721_v0 }
  0x76   :  { %1262 = vmatpush3.msra.mxu0 %v1728_v2 }
  0x77   :  { %1263 = vmatprep.subr.mxu0 %v1734_v3 }
  0x78   :  { %1264 = vmatpush3.msra.mxu0 %v1734_v3 }
  0x79   :  { %1265 = vmatprep.subr.mxu0 %v1744_v6 }
  0x7a   :  { %1266 = vmatpush3.msra.mxu0 %v1744_v6 }
  0x7b   :  { %1267 = vmatprep.subr.mxu0 %v1753_v7 }
  0x7c   :  { %1268 = vmatpush3.msra.mxu0 %v1753_v7 }
  0x7d   :  { %1269 = vmatprep.subr.mxu0 %v1760_v8 }
  0x7e   :  { %1270 = vmatpush3.msra.mxu0 %v1760_v8 }
  0x7f   :  { %1271 = vmatprep.subr.mxu0 %v1767_v9 }
  0x80   :  { %1272 = vmatpush3.msra.mxu0 %v1767_v9 }
  0x81   :  { %1273 = vmatprep.subr.mxu0 %v1774_v10 }
  0x82   :  { %1274 = vmatpush3.msra.mxu0 %v1774_v10 }
  0x83   :  { %1275 = vmatprep.subr.mxu0 %v1780_v11 }
  0x84   :  { %1276 = vmatpush3.msra.mxu0 %v1780_v11 }
  0x85   :  { %1277 = vmatprep.subr.mxu0 %v1786_v12 }
  0x86   :  { %1278 = vmatpush3.msra.mxu0 %v1786_v12 }
  0x87   :  { %1279 = vmatprep.subr.mxu0 %v1792_v13 }
  0x88   :  { %1280 = vmatpush3.msra.mxu0 %v1792_v13 }
  0x89   :  { %1281 = vmatprep.subr.mxu0 %v1798_v14 }
  0x8a   :  { %1282 = vmatpush3.msra.mxu0 %v1798_v14 }
  0x8b   :  { %1283 = vmatprep.subr.mxu0 %v1804_v15 }
  0x8c   :  { %1284 = vmatpush3.msra.mxu0 %v1804_v15 }
  0x8d   :  { %1285 = vmatprep.subr.mxu0 %v1810_v16 }
  0x8e   :  { %1286 = vmatpush3.msra.mxu0 %v1810_v16 }
  0x8f   :  { %1287 = vmatprep.subr.mxu0 %v1816_v17 }
  0x90   :  { %1288 = vmatpush3.msra.mxu0 %v1816_v17 }
  0x91   :  { %1327 = vmatprep.subr.mxu0 %v1721_v0 }
  0xc8   :  { %v163_v24 = vpop.permute.xlu0 %162 }
  0xc9   :  { %v169_v27 = vpop.permute.xlu1 %168  ;;  %v166_v35 = vadd.f32 %v163_v24, %v160_v32 }
  0xcb   :  { %v172_v45 = vadd.f32 %v169_v27, %v166_v35 }
  0xcc   :  { %v165_v31 = vpop.permute.xlu0 %164 }
  0xcd   :  { %v167_v33 = vadd.f32 %v165_v31, %v161_v28  ;;  %v171_v34 = vpop.permute.xlu1 %170  ;;  %v176_v53 = vsub.f32 %v172_v45, %v174_v41 }
  0xcf   :  { %v173_v38 = vadd.f32 %v171_v34, %v167_v33  ;;  %v178_v58 = vmul.f32 %v176_v53, %v1901_v56 }
  0xd1   :  { %v177_v47 = vsub.f32 %v173_v38, %v175_v36  ;;  %v186_v62 = vadd.f32 %v184_v59, %v178_v58 }
  0xd3   :  { %v179_v54 = vmul.f32 %v177_v47, %v1893_v49  ;;  %v188_v22 = vadd.f32 %v186_v62, %v1910_v18 }
  0xd5   :  { %v187_v60 = vadd.f32 %v185_v55, %v179_v54 }
  0xd7   :  { %v189_v63 = vadd.f32 %v187_v60, %v1907_v61 }
 0x130   :  { %v1221_v40 = vpop.f32.mrf.mxu0 }
 0x131   :  { %v262_v44 = vadd.f32 %v1221_v40, %v1885_v39 }
 0x132   :  { %v256_v48 = vpop.f32.mrf.mxu0 }
 0x133   :  { %1443 = vtanh.f32 %v262_v44  ;;  %v257_v51 = vadd.f32 %v256_v48, %v1889_v43 }
 0x135   :  { %1445 = vtanh.f32 %v257_v51 }
 0x140   :  { %v1444_v20 = vpop.eup %1443 }
 0x141   :  { %v269_v23 = vadd.f32 %v1444_v20, %v189_v63 }
 0x142   :  { %v1446_v24 = vpop.eup %1445 }
 0x143   :  { %v268_v25 = vadd.f32 %v1446_v24, %v188_v22  ;;  %v272_v26 = vmul.f32 %v270_v21, %v269_v23 }
 0x145   :  { %v271_v27 = vmul.f32 %v270_v21, %v268_v25  ;;  %v1914_v28 = vadd.f32 %v272_v26, %v1740_v5 }
 0x147   :  { %v1917_v29 = vadd.f32 %v271_v27, %v1738_v4  ;;  %277 = vst [vmem:[#allocation15 + $0x18] sm:$0xff] %v1914_v28  ;;  %290 = vrot.lane.b32.xlu1 %v1914_v28, %s1634_s30  ;;  %v279_v31 = vrot.slane %v1914_v28, 7  ;;  %v283_v32 = vrot.slane %v1914_v28, 1  ;;  %v301_v48 = vmul.f32 4.0, %v1914_v28 }
 0x148   :  { %v307_v51 = vsub.f32 1.0, %v1914_v28 }
 0x149   :  { %276 = vst [vmem:[#allocation15 + $0x10] sm:$0xff] %v1917_v29  ;;  %288 = vrot.lane.b32.xlu0 %v1917_v29, %s1634_s30  ;;  %1254 = vmatprep.mubr.f32.mxu1 %v1917_v29  ;;  %v278_v4 = vrot.slane %v1917_v29, 7  ;;  %v282_v5 = vrot.slane %v1917_v29, 1  ;;  %v300_v54 = vmul.f32 4.0, %v1917_v29  ;;  %v306_v59 = vsub.f32 1.0, %v1917_v29 }
 0x14a   :  { %1255 = vmatmul.mubr.f32.vlgmr.msra.gmra.mxu1 %v1914_v28  ;;  %v309_v62 = vmul.f32 %v307_v51, %v1914_v28 }
 0x14b   :  { %296 = vrot.lane.b32.xlu1 %v1914_v28, %s1640_s5  ;;  %1293 = vmatpush3.msra.mxu1 %v1721_v0  ;;  %v280_v33 = vsel %vm152_vm0, %v278_v4, %v279_v31  ;;  %v285_v34 = vsel %vm157_vm1, %v283_v32, %v282_v5  ;;  %v281_v36 = vsel %vm152_vm0, %v279_v31, %v278_v4 }
 0x14c   :  { %1294 = vmatprep.subr.mxu1 %v1723_v1  ;;  %v284_v37 = vsel %vm157_vm1, %v282_v5, %v283_v32  ;;  %v287_v38 = vadd.f32 %v285_v34, %v280_v33  ;;  %v308_v21 = vmul.f32 %v306_v59, %v1917_v29  ;;  %v311_v22 = vmul.f32 %v309_v62, %v1895_v50 }
 0x14d   :  { %294 = vrot.lane.b32.xlu0 %v1917_v29, %s1640_s5  ;;  %1295 = vmatpush3.msra.mxu1 %v1723_v1  ;;  %v286_v42 = vadd.f32 %v284_v37, %v281_v36  ;;  %v396_v5 = vstv %s1055_s10 }
 0x14e   :  { %1296 = vmatprep.subr.mxu1 %v1728_v2  ;;  %v310_v25 = vmul.f32 %v308_v21, %v1903_v57 }
 0x14f   :  { %1297 = vmatpush3.msra.mxu1 %v1728_v2 }
 0x150   :  { %1298 = vmatprep.subr.mxu1 %v1734_v3 }
 0x151   :  { %1299 = vmatpush3.msra.mxu1 %v1734_v3 }
 0x152   :  { %1300 = vmatprep.subr.mxu1 %v1744_v6 }
 0x153   :  { %1301 = vmatpush3.msra.mxu1 %v1744_v6 }
 0x154   :  { %1302 = vmatprep.subr.mxu1 %v1753_v7 }
 0x155   :  { %1303 = vmatpush3.msra.mxu1 %v1753_v7 }
 0x156   :  { %1304 = vmatprep.subr.mxu1 %v1760_v8 }
 0x157   :  { %1305 = vmatpush3.msra.mxu1 %v1760_v8 }
 0x158   :  { %1306 = vmatprep.subr.mxu1 %v1767_v9 }
 0x159   :  { %1307 = vmatpush3.msra.mxu1 %v1767_v9 }
 0x15a   :  { %1308 = vmatprep.subr.mxu1 %v1774_v10 }
 0x15b   :  { %1309 = vmatpush3.msra.mxu1 %v1774_v10 }
 0x15c   :  { %1310 = vmatprep.subr.mxu1 %v1780_v11 }
 0x15d   :  { %1311 = vmatpush3.msra.mxu1 %v1780_v11 }
 0x15e   :  { %1312 = vmatprep.subr.mxu1 %v1786_v12 }
 0x15f   :  { %1313 = vmatpush3.msra.mxu1 %v1786_v12 }
 0x160   :  { %1314 = vmatprep.subr.mxu1 %v1792_v13 }
 0x161   :  { %1315 = vmatpush3.msra.mxu1 %v1792_v13 }
 0x162   :  { %1316 = vmatprep.subr.mxu1 %v1798_v14 }
 0x163   :  { %1317 = vmatpush3.msra.mxu1 %v1798_v14 }
 0x164   :  { %1318 = vmatprep.subr.mxu1 %v1804_v15 }
 0x165   :  { %1319 = vmatpush3.msra.mxu1 %v1804_v15 }
 0x166   :  { %1320 = vmatprep.subr.mxu1 %v1810_v16 }
 0x167   :  { %1321 = vmatpush3.msra.mxu1 %v1810_v16 }
 0x168   :  { %1322 = vmatprep.subr.mxu1 %v1816_v17 }
 0x169   :  { %1323 = vmatpush3.msra.mxu1 %v1816_v17 }
 0x16a   :  { %1362 = vmatprep.subr.mxu1 %v1721_v0 }
 0x1b9   :  { %v291_v30 = vpop.permute.xlu1 %290 }
 0x1ba   :  { %v293_v41 = vadd.f32 %v291_v30, %v287_v38 }
 0x1bb   :  { %v289_v35 = vpop.permute.xlu0 %288 }
 0x1bc   :  { %v292_v45 = vadd.f32 %v289_v35, %v286_v42 }
 0x1bd   :  { %v297_v40 = vpop.permute.xlu1 %296 }
 0x1be   :  { %v299_v46 = vadd.f32 %v297_v40, %v293_v41 }
 0x1bf   :  { %v295_v44 = vpop.permute.xlu0 %294 }
 0x1c0   :  { %v298_v52 = vadd.f32 %v295_v44, %v292_v45  ;;  %v303_v58 = vsub.f32 %v299_v46, %v301_v48 }
 0x1c2   :  { %v302_v63 = vsub.f32 %v298_v52, %v300_v54  ;;  %v305_v20 = vmul.f32 %v303_v58, %v1893_v49 }
 0x1c4   :  { %v304_v23 = vmul.f32 %v302_v63, %v1901_v56  ;;  %v313_v24 = vadd.f32 %v311_v22, %v305_v20 }
 0x1c6   :  { %v312_v26 = vadd.f32 %v310_v25, %v304_v23  ;;  %v315_v27 = vadd.f32 %v313_v24, %v1907_v61 }
 0x1c8   :  { %v314_v30 = vadd.f32 %v312_v26, %v1910_v18 }
 0x20a   :  { %v1256_v47 = vpop.f32.mrf.mxu1 }
 0x20b   :  { %v388_v53 = vadd.f32 %v1256_v47, %v1885_v39 }
 0x20c   :  { %v382_v55 = vpop.f32.mrf.mxu1 }
 0x20d   :  { %1447 = vtanh.f32 %v388_v53  ;;  %v383_v60 = vadd.f32 %v382_v55, %v1889_v43 }
 0x20f   :  { %1449 = vtanh.f32 %v383_v60 }
 0x21a   :  { %v1448_v4 = vpop.eup %1447 }
 0x21b   :  { %v395_v31 = vadd.f32 %v1448_v4, %v315_v27 }
 0x21c   :  { %v1450_v32 = vpop.eup %1449 }
 0x21d   :  { %v398_v33 = vmul.f32 %v396_v5, %v395_v31  ;;  %v394_v34 = vadd.f32 %v1450_v32, %v314_v30 }
 0x21f   :  { %v1990_v35 = vadd.f32 %v398_v33, %v1914_v28  ;;  %v397_v36 = vmul.f32 %v396_v5, %v394_v34 }
 0x221   :  { %403 = vst [vmem:[#allocation15 + $0x28] sm:$0xff] %v1990_v35  ;;  %v1994_v37 = vadd.f32 %v397_v36, %v1917_v29  ;;  %416 = vrot.lane.b32.xlu1 %v1990_v35, %s1634_s30  ;;  %v405_v40 = vrot.slane %v1990_v35, 7  ;;  %v409_v41 = vrot.slane %v1990_v35, 1  ;;  %v427_v60 = vmul.f32 4.0, %v1990_v35 }
 0x222   :  { %v433_v62 = vsub.f32 1.0, %v1990_v35 }
 0x223   :  { %402 = vst [vmem:[#allocation15 + $0x20] sm:$0xff] %v1994_v37  ;;  %414 = vrot.lane.b32.xlu0 %v1994_v37, %s1634_s30  ;;  %1289 = vmatprep.mubr.f32.mxu0 %v1994_v37  ;;  %v404_v28 = vrot.slane %v1994_v37, 7  ;;  %v408_v29 = vrot.slane %v1994_v37, 1  ;;  %v426_v21 = vmul.f32 4.0, %v1994_v37  ;;  %v432_v24 = vsub.f32 1.0, %v1994_v37 }
 0x224   :  { %1290 = vmatmul.mubr.f32.vlgmr.msra.gmra.mxu0 %v1990_v35  ;;  %v435_v26 = vmul.f32 %v433_v62, %v1990_v35 }
 0x225   :  { %422 = vrot.lane.b32.xlu1 %v1990_v35, %s1640_s5  ;;  %1328 = vmatpush3.msra.mxu0 %v1721_v0  ;;  %v406_v42 = vsel %vm152_vm0, %v404_v28, %v405_v40  ;;  %v411_v44 = vsel %vm157_vm1, %v409_v41, %v408_v29  ;;  %v407_v46 = vsel %vm152_vm0, %v405_v40, %v404_v28 }
 0x226   :  { %1329 = vmatprep.subr.mxu0 %v1723_v1  ;;  %v410_v47 = vsel %vm157_vm1, %v408_v29, %v409_v41  ;;  %v413_v48 = vadd.f32 %v411_v44, %v406_v42  ;;  %v434_v5 = vmul.f32 %v432_v24, %v1994_v37  ;;  %v437_v30 = vmul.f32 %v435_v26, %v1895_v50 }
 0x227   :  { %420 = vrot.lane.b32.xlu0 %v1994_v37, %s1640_s5  ;;  %1330 = vmatpush3.msra.mxu0 %v1723_v1  ;;  %v412_v53 = vadd.f32 %v410_v47, %v407_v46  ;;  %v522_v29 = vstv %s1056_s11 }
 0x228   :  { %1331 = vmatprep.subr.mxu0 %v1728_v2  ;;  %v436_v33 = vmul.f32 %v434_v5, %v1903_v57 }
 0x229   :  { %1332 = vmatpush3.msra.mxu0 %v1728_v2 }
 0x22a   :  { %1333 = vmatprep.subr.mxu0 %v1734_v3 }
 0x22b   :  { %1334 = vmatpush3.msra.mxu0 %v1734_v3 }
 0x22c   :  { %1335 = vmatprep.subr.mxu0 %v1744_v6 }
 0x22d   :  { %1336 = vmatpush3.msra.mxu0 %v1744_v6 }
 0x22e   :  { %1337 = vmatprep.subr.mxu0 %v1753_v7 }
 0x22f   :  { %1338 = vmatpush3.msra.mxu0 %v1753_v7 }
 0x230   :  { %1339 = vmatprep.subr.mxu0 %v1760_v8 }
 0x231   :  { %1340 = vmatpush3.msra.mxu0 %v1760_v8 }
 0x232   :  { %1341 = vmatprep.subr.mxu0 %v1767_v9 }
 0x233   :  { %1342 = vmatpush3.msra.mxu0 %v1767_v9 }
 0x234   :  { %1343 = vmatprep.subr.mxu0 %v1774_v10 }
 0x235   :  { %1344 = vmatpush3.msra.mxu0 %v1774_v10 }
 0x236   :  { %1345 = vmatprep.subr.mxu0 %v1780_v11 }
 0x237   :  { %1346 = vmatpush3.msra.mxu0 %v1780_v11 }
 0x238   :  { %1347 = vmatprep.subr.mxu0 %v1786_v12 }
 0x239   :  { %1348 = vmatpush3.msra.mxu0 %v1786_v12 }
 0x23a   :  { %1349 = vmatprep.subr.mxu0 %v1792_v13 }
 0x23b   :  { %1350 = vmatpush3.msra.mxu0 %v1792_v13 }
 0x23c   :  { %1351 = vmatprep.subr.mxu0 %v1798_v14 }
 0x23d   :  { %1352 = vmatpush3.msra.mxu0 %v1798_v14 }
 0x23e   :  { %1353 = vmatprep.subr.mxu0 %v1804_v15 }
 0x23f   :  { %1354 = vmatpush3.msra.mxu0 %v1804_v15 }
 0x240   :  { %1355 = vmatprep.subr.mxu0 %v1810_v16 }
 0x241   :  { %1356 = vmatpush3.msra.mxu0 %v1810_v16 }
 0x242   :  { %1357 = vmatprep.subr.mxu0 %v1816_v17 }
 0x243   :  { %1358 = vmatpush3.msra.mxu0 %v1816_v17 }
 0x244   :  { %1397 = vmatprep.subr.mxu0 %v1721_v0 }
 0x293   :  { %v417_v38 = vpop.permute.xlu1 %416 }
 0x294   :  { %v419_v52 = vadd.f32 %v417_v38, %v413_v48 }
 0x295   :  { %v415_v45 = vpop.permute.xlu0 %414 }
 0x296   :  { %v418_v55 = vadd.f32 %v415_v45, %v412_v53 }
 0x297   :  { %v423_v51 = vpop.permute.xlu1 %422 }
 0x298   :  { %v425_v58 = vadd.f32 %v423_v51, %v419_v52 }
 0x299   :  { %v421_v54 = vpop.permute.xlu0 %420 }
 0x29a   :  { %v424_v63 = vadd.f32 %v421_v54, %v418_v55  ;;  %v429_v23 = vsub.f32 %v425_v58, %v427_v60 }
 0x29c   :  { %v428_v27 = vsub.f32 %v424_v63, %v426_v21  ;;  %v431_v4 = vmul.f32 %v429_v23, %v1893_v49 }
 0x29e   :  { %v430_v31 = vmul.f32 %v428_v27, %v1901_v56  ;;  %v439_v32 = vadd.f32 %v437_v30, %v431_v4 }
 0x2a0   :  { %v438_v34 = vadd.f32 %v436_v33, %v430_v31  ;;  %v441_v36 = vadd.f32 %v439_v32, %v1907_v61 }
 0x2a2   :  { %v440_v38 = vadd.f32 %v438_v34, %v1910_v18 }
 0x2e4   :  { %v1291_v59 = vpop.f32.mrf.mxu0 }
 0x2e5   :  { %v514_v20 = vadd.f32 %v1291_v59, %v1885_v39 }
 0x2e6   :  { %v508_v22 = vpop.f32.mrf.mxu0 }
 0x2e7   :  { %1451 = vtanh.f32 %v514_v20  ;;  %v509_v25 = vadd.f32 %v508_v22, %v1889_v43 }
 0x2e9   :  { %1453 = vtanh.f32 %v509_v25 }
 0x2f4   :  { %v1452_v28 = vpop.eup %1451 }
 0x2f5   :  { %v521_v40 = vadd.f32 %v1452_v28, %v441_v36 }
 0x2f6   :  { %v1454_v41 = vpop.eup %1453 }
 0x2f7   :  { %v524_v42 = vmul.f32 %v522_v29, %v521_v40  ;;  %v520_v44 = vadd.f32 %v1454_v41, %v440_v38 }
 0x2f9   :  { %v2066_v45 = vadd.f32 %v524_v42, %v1990_v35  ;;  %v523_v46 = vmul.f32 %v522_v29, %v520_v44 }
 0x2fb   :  { %529 = vst [vmem:[#allocation15 + $0x38] sm:$0xff] %v2066_v45  ;;  %v2070_v47 = vadd.f32 %v523_v46, %v1994_v37  ;;  %542 = vrot.lane.b32.xlu1 %v2066_v45, %s1634_s30  ;;  %v531_v51 = vrot.slane %v2066_v45, 7  ;;  %v535_v52 = vrot.slane %v2066_v45, 1  ;;  %v553_v25 = vmul.f32 4.0, %v2066_v45 }
 0x2fc   :  { %v559_v26 = vsub.f32 1.0, %v2066_v45 }
 0x2fd   :  { %528 = vst [vmem:[#allocation15 + $0x30] sm:$0xff] %v2070_v47  ;;  %540 = vrot.lane.b32.xlu0 %v2070_v47, %s1634_s30  ;;  %1324 = vmatprep.mubr.f32.mxu1 %v2070_v47  ;;  %v530_v35 = vrot.slane %v2070_v47, 7  ;;  %v534_v37 = vrot.slane %v2070_v47, 1  ;;  %v552_v5 = vmul.f32 4.0, %v2070_v47  ;;  %v558_v32 = vsub.f32 1.0, %v2070_v47 }
 0x2fe   :  { %1325 = vmatmul.mubr.f32.vlgmr.msra.gmra.mxu1 %v2066_v45  ;;  %v561_v34 = vmul.f32 %v559_v26, %v2066_v45 }
 0x2ff   :  { %548 = vrot.lane.b32.xlu1 %v2066_v45, %s1640_s5  ;;  %1363 = vmatpush3.msra.mxu1 %v1721_v0  ;;  %v532_v53 = vsel %vm152_vm0, %v530_v35, %v531_v51  ;;  %v537_v54 = vsel %vm157_vm1, %v535_v52, %v534_v37  ;;  %v533_v58 = vsel %vm152_vm0, %v531_v51, %v530_v35 }
 0x300   :  { %1364 = vmatprep.subr.mxu1 %v1723_v1  ;;  %v536_v59 = vsel %vm157_vm1, %v534_v37, %v535_v52  ;;  %v539_v60 = vadd.f32 %v537_v54, %v532_v53  ;;  %v560_v29 = vmul.f32 %v558_v32, %v2070_v47  ;;  %v563_v38 = vmul.f32 %v561_v34, %v1895_v50 }
 0x301   :  { %546 = vrot.lane.b32.xlu0 %v2070_v47, %s1640_s5  ;;  %1365 = vmatpush3.msra.mxu1 %v1723_v1  ;;  %v538_v20 = vadd.f32 %v536_v59, %v533_v58  ;;  %v648_v37 = vstv %s1057_s12 }
 0x302   :  { %1366 = vmatprep.subr.mxu1 %v1728_v2  ;;  %v562_v42 = vmul.f32 %v560_v29, %v1903_v57  ;;  %v774_v29 = vstv %s1058_s13 }
 0x303   :  { %1367 = vmatpush3.msra.mxu1 %v1728_v2 }
 0x304   :  { %1368 = vmatprep.subr.mxu1 %v1734_v3 }
 0x305   :  { %1369 = vmatpush3.msra.mxu1 %v1734_v3 }
 0x306   :  { %1370 = vmatprep.subr.mxu1 %v1744_v6 }
 0x307   :  { %1371 = vmatpush3.msra.mxu1 %v1744_v6 }
 0x308   :  { %1372 = vmatprep.subr.mxu1 %v1753_v7 }
 0x309   :  { %1373 = vmatpush3.msra.mxu1 %v1753_v7 }
 0x30a   :  { %1374 = vmatprep.subr.mxu1 %v1760_v8 }
 0x30b   :  { %1375 = vmatpush3.msra.mxu1 %v1760_v8 }
 0x30c   :  { %1376 = vmatprep.subr.mxu1 %v1767_v9 }
 0x30d   :  { %1377 = vmatpush3.msra.mxu1 %v1767_v9 }
 0x30e   :  { %1378 = vmatprep.subr.mxu1 %v1774_v10 }
 0x30f   :  { %1379 = vmatpush3.msra.mxu1 %v1774_v10 }
 0x310   :  { %1380 = vmatprep.subr.mxu1 %v1780_v11 }
 0x311   :  { %1381 = vmatpush3.msra.mxu1 %v1780_v11 }
 0x312   :  { %1382 = vmatprep.subr.mxu1 %v1786_v12 }
 0x313   :  { %1383 = vmatpush3.msra.mxu1 %v1786_v12 }
 0x314   :  { %1384 = vmatprep.subr.mxu1 %v1792_v13 }
 0x315   :  { %1385 = vmatpush3.msra.mxu1 %v1792_v13 }
 0x316   :  { %1386 = vmatprep.subr.mxu1 %v1798_v14 }
 0x317   :  { %1387 = vmatpush3.msra.mxu1 %v1798_v14 }
 0x318   :  { %1388 = vmatprep.subr.mxu1 %v1804_v15 }
 0x319   :  { %1389 = vmatpush3.msra.mxu1 %v1804_v15 }
 0x31a   :  { %1390 = vmatprep.subr.mxu1 %v1810_v16 }
 0x31b   :  { %1391 = vmatpush3.msra.mxu1 %v1810_v16 }
 0x31c   :  { %1392 = vmatprep.subr.mxu1 %v1816_v17 }
 0x31d   :  { %1393 = vmatpush3.msra.mxu1 %v1816_v17 }
 0x36d   :  { %v543_v48 = vpop.permute.xlu1 %542 }
 0x36e   :  { %v545_v63 = vadd.f32 %v543_v48, %v539_v60 }
 0x36f   :  { %v541_v55 = vpop.permute.xlu0 %540 }
 0x370   :  { %v544_v22 = vadd.f32 %v541_v55, %v538_v20 }
 0x371   :  { %v549_v62 = vpop.permute.xlu1 %548 }
 0x372   :  { %v551_v23 = vadd.f32 %v549_v62, %v545_v63 }
 0x373   :  { %v547_v21 = vpop.permute.xlu0 %546 }
 0x374   :  { %v550_v27 = vadd.f32 %v547_v21, %v544_v22  ;;  %v555_v31 = vsub.f32 %v551_v23, %v553_v25 }
 0x376   :  { %v554_v36 = vsub.f32 %v550_v27, %v552_v5  ;;  %v557_v28 = vmul.f32 %v555_v31, %v1893_v49 }
 0x378   :  { %v556_v40 = vmul.f32 %v554_v36, %v1901_v56  ;;  %v565_v41 = vadd.f32 %v563_v38, %v557_v28 }
 0x37a   :  { %v564_v44 = vadd.f32 %v562_v42, %v556_v40  ;;  %v567_v46 = vadd.f32 %v565_v41, %v1907_v61 }
 0x37c   :  { %v566_v48 = vadd.f32 %v564_v44, %v1910_v18 }
 0x3be   :  { %v1326_v24 = vpop.f32.mrf.mxu1 }
 0x3bf   :  { %v640_v4 = vadd.f32 %v1326_v24, %v1885_v39 }
 0x3c0   :  { %v634_v30 = vpop.f32.mrf.mxu1 }
 0x3c1   :  { %1455 = vtanh.f32 %v640_v4  ;;  %v635_v33 = vadd.f32 %v634_v30, %v1889_v43 }
 0x3c3   :  { %1457 = vtanh.f32 %v635_v33 }
 0x3ce   :  { %v1456_v35 = vpop.eup %1455 }
 0x3cf   :  { %v647_v51 = vadd.f32 %v1456_v35, %v567_v46 }
 0x3d0   :  { %v1458_v52 = vpop.eup %1457 }
 0x3d1   :  { %v650_v53 = vmul.f32 %v648_v37, %v647_v51  ;;  %v646_v54 = vadd.f32 %v1458_v52, %v566_v48 }
 0x3d3   :  { %v2141_v55 = vadd.f32 %v650_v53, %v2066_v45  ;;  %v649_v58 = vmul.f32 %v648_v37, %v646_v54 }
 0x3d5   :  { %655 = vst [vmem:[#allocation15 + $0x48] sm:$0xff] %v2141_v55  ;;  %v2145_v59 = vadd.f32 %v649_v58, %v2070_v47  ;;  %668 = vrot.lane.b32.xlu1 %v2141_v55, %s1634_s30  ;;  %v679_v60 = vmul.f32 4.0, %v2141_v55  ;;  %v685_v62 = vsub.f32 1.0, %v2141_v55 }
 0x3d7   :  { %654 = vst [vmem:[#allocation15 + $0x40] sm:$0xff] %v2145_v59  ;;  %666 = vrot.lane.b32.xlu0 %v2145_v59, %s1634_s30  ;;  %1359 = vmatprep.mubr.f32.mxu0 %v2145_v59  ;;  %v678_v21 = vmul.f32 4.0, %v2145_v59  ;;  %v684_v24 = vsub.f32 1.0, %v2145_v59  ;;  %v687_v26 = vmul.f32 %v685_v62, %v2141_v55 }
 0x3d8   :  { %1360 = vmatmul.mubr.f32.vlgmr.msra.gmra.mxu0 %v2141_v55 }
 0x3d9   :  { %674 = vrot.lane.b32.xlu1 %v2141_v55, %s1640_s5  ;;  %1398 = vmatpush3.msra.mxu0 %v1721_v0  ;;  %v656_v0 = vrot.slane %v2145_v59, 7  ;;  %v686_v5 = vmul.f32 %v684_v24, %v2145_v59  ;;  %v689_v30 = vmul.f32 %v687_v26, %v1895_v50 }
 0x3da   :  { %1399 = vmatprep.subr.mxu0 %v1723_v1 }
 0x3db   :  { %672 = vrot.lane.b32.xlu0 %v2145_v59, %s1640_s5  ;;  %1400 = vmatpush3.msra.mxu0 %v1723_v1  ;;  %v660_v1 = vrot.slane %v2145_v59, 1  ;;  %v688_v33 = vmul.f32 %v686_v5, %v1903_v57  ;;  %v900_v5 = vstv %s1059_s14 }
 0x3dc   :  { %1401 = vmatprep.subr.mxu0 %v1728_v2 }
 0x3dd   :  { %1402 = vmatpush3.msra.mxu0 %v1728_v2 }
 0x3de   :  { %1403 = vmatprep.subr.mxu0 %v1734_v3 }
 0x3df   :  { %1404 = vmatpush3.msra.mxu0 %v1734_v3  ;;  %v657_v3 = vrot.slane %v2141_v55, 7 }
 0x3e0   :  { %1405 = vmatprep.subr.mxu0 %v1744_v6 }
 0x3e1   :  { %1406 = vmatpush3.msra.mxu0 %v1744_v6  ;;  %v661_v6 = vrot.slane %v2141_v55, 1 }
 0x3e2   :  { %1407 = vmatprep.subr.mxu0 %v1753_v7 }
 0x3e3   :  { %1408 = vmatpush3.msra.mxu0 %v1753_v7  ;;  %v658_v7 = vsel %vm152_vm0, %v656_v0, %v657_v3 }
 0x3e4   :  { %1409 = vmatprep.subr.mxu0 %v1760_v8 }
 0x3e5   :  { %1410 = vmatpush3.msra.mxu0 %v1760_v8  ;;  %v663_v8 = vsel %vm157_vm1, %v661_v6, %v660_v1 }
 0x3e6   :  { %1411 = vmatprep.subr.mxu0 %v1767_v9 }
 0x3e7   :  { %1412 = vmatpush3.msra.mxu0 %v1767_v9 }
 0x3e8   :  { %1413 = vmatprep.subr.mxu0 %v1774_v10 }
 0x3e9   :  { %1414 = vmatpush3.msra.mxu0 %v1774_v10  ;;  %v659_v10 = vsel %vm152_vm0, %v657_v3, %v656_v0 }
 0x3ea   :  { %1415 = vmatprep.subr.mxu0 %v1780_v11 }
 0x3eb   :  { %1416 = vmatpush3.msra.mxu0 %v1780_v11  ;;  %v662_v11 = vsel %vm157_vm1, %v660_v1, %v661_v6 }
 0x3ec   :  { %1417 = vmatprep.subr.mxu0 %v1786_v12 }
 0x3ed   :  { %1418 = vmatpush3.msra.mxu0 %v1786_v12  ;;  %v665_v12 = vadd.f32 %v663_v8, %v658_v7 }
 0x3ee   :  { %1419 = vmatprep.subr.mxu0 %v1792_v13 }
 0x3ef   :  { %1420 = vmatpush3.msra.mxu0 %v1792_v13 }
 0x3f0   :  { %1421 = vmatprep.subr.mxu0 %v1798_v14 }
 0x3f1   :  { %1422 = vmatpush3.msra.mxu0 %v1798_v14 }
 0x3f2   :  { %1423 = vmatprep.subr.mxu0 %v1804_v15 }
 0x3f3   :  { %1424 = vmatpush3.msra.mxu0 %v1804_v15  ;;  %v664_v15 = vadd.f32 %v662_v11, %v659_v10 }
 0x3f4   :  { %1425 = vmatprep.subr.mxu0 %v1810_v16 }
 0x3f5   :  { %1426 = vmatpush3.msra.mxu0 %v1810_v16 }
 0x3f6   :  { %1427 = vmatprep.subr.mxu0 %v1816_v17 }
 0x3f7   :  { %1428 = vmatpush3.msra.mxu0 %v1816_v17 }
 0x447   :  { %v669_v2 = vpop.permute.xlu1 %668 }
 0x448   :  { %v671_v14 = vadd.f32 %v669_v2, %v665_v12 }
 0x449   :  { %v667_v9 = vpop.permute.xlu0 %666 }
 0x44a   :  { %v670_v17 = vadd.f32 %v667_v9, %v664_v15 }
 0x44b   :  { %v675_v13 = vpop.permute.xlu1 %674 }
 0x44c   :  { %v677_v45 = vadd.f32 %v675_v13, %v671_v14 }
 0x44d   :  { %v673_v16 = vpop.permute.xlu0 %672 }
 0x44e   :  { %v676_v63 = vadd.f32 %v673_v16, %v670_v17  ;;  %v681_v23 = vsub.f32 %v677_v45, %v679_v60 }
 0x450   :  { %v680_v27 = vsub.f32 %v676_v63, %v678_v21  ;;  %v683_v4 = vmul.f32 %v681_v23, %v1893_v49 }
 0x452   :  { %v682_v31 = vmul.f32 %v680_v27, %v1901_v56  ;;  %v691_v32 = vadd.f32 %v689_v30, %v683_v4 }
 0x454   :  { %v690_v34 = vadd.f32 %v688_v33, %v682_v31  ;;  %v693_v36 = vadd.f32 %v691_v32, %v1907_v61 }
 0x456   :  { %v692_v38 = vadd.f32 %v690_v34, %v1910_v18 }
 0x498   :  { %v1361_v47 = vpop.f32.mrf.mxu0 }
 0x499   :  { %v766_v20 = vadd.f32 %v1361_v47, %v1885_v39 }
 0x49a   :  { %v760_v22 = vpop.f32.mrf.mxu0 }
 0x49b   :  { %1459 = vtanh.f32 %v766_v20  ;;  %v761_v25 = vadd.f32 %v760_v22, %v1889_v43 }
 0x49d   :  { %1461 = vtanh.f32 %v761_v25 }
 0x4a8   :  { %v1460_v28 = vpop.eup %1459 }
 0x4a9   :  { %v773_v40 = vadd.f32 %v1460_v28, %v693_v36 }
 0x4aa   :  { %v1462_v41 = vpop.eup %1461 }
 0x4ab   :  { %v776_v42 = vmul.f32 %v774_v29, %v773_v40  ;;  %v772_v44 = vadd.f32 %v1462_v41, %v692_v38 }
 0x4ad   :  { %v778_v46 = vadd.f32 %v776_v42, %v2141_v55  ;;  %v775_v35 = vmul.f32 %v774_v29, %v772_v44 }
 0x4af   :  { %781 = vst [vmem:[#allocation15 + $0x58] sm:$0xff] %v778_v46  ;;  %v777_v37 = vadd.f32 %v775_v35, %v2145_v59  ;;  %794 = vrot.lane.b32.xlu1 %v778_v46, %s1634_s30  ;;  %v783_v53 = vrot.slane %v778_v46, 7  ;;  %v787_v54 = vrot.slane %v778_v46, 1  ;;  %v805_v12 = vmul.f32 4.0, %v778_v46 }
 0x4b0   :  { %v811_v13 = vsub.f32 1.0, %v778_v46 }
 0x4b1   :  { %780 = vst [vmem:[#allocation15 + $0x50] sm:$0xff] %v777_v37  ;;  %792 = vrot.lane.b32.xlu0 %v777_v37, %s1634_s30  ;;  %1394 = vmatprep.mubr.f32.mxu1 %v777_v37  ;;  %v782_v48 = vrot.slane %v777_v37, 7  ;;  %v786_v51 = vrot.slane %v777_v37, 1  ;;  %v804_v16 = vmul.f32 4.0, %v777_v37  ;;  %v810_v47 = vsub.f32 1.0, %v777_v37 }
 0x4b2   :  { %1395 = vmatmul.mubr.f32.vlgmr.msra.gmra.mxu1 %v778_v46  ;;  %v813_v62 = vmul.f32 %v811_v13, %v778_v46 }
 0x4b3   :  { %800 = vrot.lane.b32.xlu1 %v778_v46, %s1640_s5  ;;  %v784_v55 = vsel %vm152_vm0, %v782_v48, %v783_v53  ;;  %v789_v58 = vsel %vm157_vm1, %v787_v54, %v786_v51  ;;  %v785_v0 = vsel %vm152_vm0, %v783_v53, %v782_v48  ;;  %v788_v1 = vsel %vm157_vm1, %v786_v51, %v787_v54 }
 0x4b4   :  { %v791_v2 = vadd.f32 %v789_v58, %v784_v55  ;;  %v790_v7 = vadd.f32 %v788_v1, %v785_v0  ;;  %v812_v21 = vmul.f32 %v810_v47, %v777_v37  ;;  %v815_v22 = vmul.f32 %v813_v62, %v1895_v50 }
 0x4b5   :  { %798 = vrot.lane.b32.xlu0 %v777_v37, %s1640_s5 }
 0x4b6   :  { %v814_v25 = vmul.f32 %v812_v21, %v1903_v57 }
 0x521   :  { %v795_v52 = vpop.permute.xlu1 %794 }
 0x522   :  { %v797_v6 = vadd.f32 %v795_v52, %v791_v2 }
 0x523   :  { %v793_v59 = vpop.permute.xlu0 %792 }
 0x524   :  { %v796_v9 = vadd.f32 %v793_v59, %v790_v7 }
 0x525   :  { %v801_v3 = vpop.permute.xlu1 %800 }
 0x526   :  { %v803_v10 = vadd.f32 %v801_v3, %v797_v6 }
 0x527   :  { %v799_v8 = vpop.permute.xlu0 %798 }
 0x528   :  { %v802_v14 = vadd.f32 %v799_v8, %v796_v9  ;;  %v807_v45 = vsub.f32 %v803_v10, %v805_v12 }
 0x52a   :  { %v806_v63 = vsub.f32 %v802_v14, %v804_v16  ;;  %v809_v20 = vmul.f32 %v807_v45, %v1893_v49 }
 0x52c   :  { %v808_v23 = vmul.f32 %v806_v63, %v1901_v56  ;;  %v817_v24 = vadd.f32 %v815_v22, %v809_v20  ;;  %v1026_v63 = vstv %s1060_s15 }
 0x52e   :  { %v816_v26 = vadd.f32 %v814_v25, %v808_v23  ;;  %v819_v27 = vadd.f32 %v817_v24, %v1907_v61 }
 0x530   :  { %v818_v30 = vadd.f32 %v816_v26, %v1910_v18 }
 0x572   :  { %v1396_v11 = vpop.f32.mrf.mxu1 }
 0x573   :  { %v892_v15 = vadd.f32 %v1396_v11, %v1885_v39 }
 0x574   :  { %v886_v17 = vpop.f32.mrf.mxu1 }
 0x575   :  { %1463 = vtanh.f32 %v892_v15  ;;  %v887_v60 = vadd.f32 %v886_v17, %v1889_v43 }
 0x577   :  { %1465 = vtanh.f32 %v887_v60 }
 0x582   :  { %v1464_v4 = vpop.eup %1463 }
 0x583   :  { %v899_v31 = vadd.f32 %v1464_v4, %v819_v27 }
 0x584   :  { %v1466_v32 = vpop.eup %1465 }
 0x585   :  { %v902_v33 = vmul.f32 %v900_v5, %v899_v31  ;;  %v898_v34 = vadd.f32 %v1466_v32, %v818_v30 }
 0x587   :  { %v904_v36 = vadd.f32 %v902_v33, %v778_v46  ;;  %v901_v28 = vmul.f32 %v900_v5, %v898_v34 }
 0x589   :  { %907 = vst [vmem:[#allocation15 + $0x68] sm:$0xff] %v904_v36  ;;  %v903_v29 = vadd.f32 %v901_v28, %v777_v37  ;;  %920 = vrot.lane.b32.xlu1 %v904_v36, %s1634_s30  ;;  %v909_v42 = vrot.slane %v904_v36, 7  ;;  %v913_v44 = vrot.slane %v904_v36, 1  ;;  %v931_v2 = vmul.f32 4.0, %v904_v36 }
 0x58a   :  { %v937_v3 = vsub.f32 1.0, %v904_v36 }
 0x58b   :  { %906 = vst [vmem:[#allocation15 + $0x60] sm:$0xff] %v903_v29  ;;  %918 = vrot.lane.b32.xlu0 %v903_v29, %s1634_s30  ;;  %1429 = vmatprep.mubr.f32.mxu0 %v903_v29  ;;  %v908_v38 = vrot.slane %v903_v29, 7  ;;  %v912_v40 = vrot.slane %v903_v29, 1  ;;  %v930_v8 = vmul.f32 4.0, %v903_v29  ;;  %v936_v11 = vsub.f32 1.0, %v903_v29 }
 0x58c   :  { %1430 = vmatmul.mubr.f32.vlgmr.msra.gmra.mxu0 %v904_v36  ;;  %v939_v12 = vmul.f32 %v937_v3, %v904_v36 }
 0x58d   :  { %926 = vrot.lane.b32.xlu1 %v904_v36, %s1640_s5  ;;  %v910_v46 = vsel %vm152_vm0, %v908_v38, %v909_v42  ;;  %v915_v35 = vsel %vm157_vm1, %v913_v44, %v912_v40  ;;  %v911_v48 = vsel %vm152_vm0, %v909_v42, %v908_v38  ;;  %v914_v51 = vsel %vm157_vm1, %v912_v40, %v913_v44 }
 0x58e   :  { %v917_v52 = vadd.f32 %v915_v35, %v910_v46  ;;  %v916_v55 = vadd.f32 %v914_v51, %v911_v48  ;;  %v938_v15 = vmul.f32 %v936_v11, %v903_v29  ;;  %v941_v16 = vmul.f32 %v939_v12, %v1895_v50 }
 0x58f   :  { %924 = vrot.lane.b32.xlu0 %v903_v29, %s1640_s5 }
 0x5fb   :  { %v921_v41 = vpop.permute.xlu1 %920 }
 0x5fc   :  { %v923_v54 = vadd.f32 %v921_v41, %v917_v52 }
 0x5fd   :  { %v919_v37 = vpop.permute.xlu0 %918 }
 0x5fe   :  { %v922_v59 = vadd.f32 %v919_v37, %v916_v55 }
 0x5ff   :  { %v927_v53 = vpop.permute.xlu1 %926 }
 0x600   :  { %v929_v0 = vadd.f32 %v927_v53, %v923_v54 }
 0x601   :  { %v925_v58 = vpop.permute.xlu0 %924 }
 0x602   :  { %v928_v6 = vadd.f32 %v925_v58, %v922_v59  ;;  %v933_v10 = vsub.f32 %v929_v0, %v931_v2 }
 0x604   :  { %v932_v13 = vsub.f32 %v928_v6, %v930_v8  ;;  %v935_v14 = vmul.f32 %v933_v10, %v1893_v49 }
 0x606   :  { %v934_v17 = vmul.f32 %v932_v13, %v1901_v56  ;;  %v943_v45 = vadd.f32 %v941_v16, %v935_v14 }
 0x608   :  { %v945_v60 = vadd.f32 %v943_v45, %v1907_v61 }
 0x64c   :  { %v1431_v1 = vpop.f32.mrf.mxu0 }
 0x64d   :  { %v1018_v7 = vadd.f32 %v1431_v1, %v1885_v39  ;;  %v940_v39 = vmul.f32 %v938_v15, %v1903_v57 }
 0x64e   :  { %v1012_v9 = vpop.f32.mrf.mxu0 }
 0x64f   :  { %1467 = vtanh.f32 %v1018_v7  ;;  %v1013_v19 = vadd.f32 %v1012_v9, %v1889_v43  ;;  %v942_v47 = vadd.f32 %v940_v39, %v934_v17 }
 0x651   :  { %1469 = vtanh.f32 %v1013_v19  ;;  %v944_v43 = vadd.f32 %v942_v47, %v1910_v18 }
 0x65c   :  { %v1468_v62 = vpop.eup %1467 }
 0x65d   :  { %v1025_v20 = vadd.f32 %v1468_v62, %v945_v60 }
 0x65e   :  { %v1470_v21 = vpop.eup %1469 }
 0x65f   :  { %v1028_v22 = vmul.f32 %v1026_v63, %v1025_v20  ;;  %v1024_v49 = vadd.f32 %v1470_v21, %v944_v43 }
 0x661   :  { %v1030_v23 = vadd.f32 %v1028_v22, %v904_v36  ;;  %v1027_v50 = vmul.f32 %v1026_v63, %v1024_v49 }
 0x663   :  { %1033 = vst [vmem:[#allocation15 + $0x78] sm:$0xff] %v1030_v23  ;;  %v1029_v56 = vadd.f32 %v1027_v50, %v903_v29 }
 0x665   :  { %1032 = vst [vmem:[#allocation15 + $0x70] sm:$0xff] %v1029_v56 }
 0x666   :  { %1610 = shalt.err (!%p1607_p6)
}
 0x667   :  { %1045 = dma.vmem_to_hbm [thread:$0]  %s1040_s16, 2048, %s2270_s7, [#allocation4], %s1633_s29, %s1633_s29, %s1634_s30  }
 0x668   :  { %1629 = dma.done.wait [#allocation4], 2048  }
 0x669   :  { %1630 = vsyncadd [#allocation4], 4294965248 }
 0x66a   :  { %1049 = vsyncpa [#allocation3], 1 }
 0x66b   :  { %1050 = vsyncpa [#allocation8], 1 }
 0x66c   :  { %1051 = vsyncpa [#allocation11], 1 }
 0x66d   :  { %1052 = vsyncpa [#allocation14], 1 }
 0x66e   :  { %1053 = vsyncpa [#allocation4], 1 }
 0x66f   :  { %1054 = vsyncpa [#allocation5], 1 }

</bundles_post_ra>
